<compile_context>
chip_gen: v6e
topology: v6e:2x2x1
jax: 0.10.0
libtpu: 0.0.40
codegen_flags: <defaults>
</compile_context>

<pallas_src>
import functools

import jax
import jax.numpy as jnp
from jax.experimental import pallas as pl
from jax.experimental.pallas import tpu as pltpu

# ----------------------------- small config ---------------------------------
B = 2
C = 4                      # input image channels
H = W = 16                 # input spatial size
G4_D1 = G4_D2 = 4          # the two summed-out axes of the 4-D gene tensor
GENE_NUM = 6               # opts.gene_num (editable slice of the gene vector)
GENE_DIM = GENE_NUM + 2    # trailing 2 entries = class logits used by argmax
G4_FLAT = G4_D1 * G4_D2 * GENE_DIM          # 128 -> exactly one vreg lane row
N_STYLES = 16              # opts.decoder == 'style3'
STYLE_DIM = 32             # per-style latent width (512 in the real model)
Z_DIM = 64                 # mapping z width (512 in the real model)
W_DIM = 32                 # mapping output width
IMG_C = 3
IMG_HW = 16
IMG_PIX = IMG_C * IMG_HW * IMG_HW           # 768 = 6 * 128 lanes (lane-dense)
K_CODES = N_STYLES * STYLE_DIM              # 512 = 4 * 128 lanes (lane-dense)
X_COLS = C * H * W                          # 1024 lane-dense image input
SEL_COLS = GENE_DIM + 2 * GENE_NUM          # gene | edit(class0) | edit(class1)
MB = 8                     # rows per grid step; 8 = f32 sublane pack (v5e-safe)


# ------------------------------- kernel --------------------------------------
def _psp_fused_kernel(interp, input_code,
                      x_ref, gene_ref, z_ref,
                      sel_ref, w_enc_ref, w_map_ref, w_sm_ref, w_img_ref,
                      img_ref, codes_ref):
    nb = gene_ref.shape[0]
    ones_col = jnp.ones((nb, 1), jnp.bfloat16)

    # ---- gene.sum((1, 2)) AND both eigen-edit candidates in ONE constant
    # matmul: cols [0:8]=gene, [8:14]=gene@M0 (pre-relu), [14:20]=gene@M1 ------
    gsel = jnp.dot(gene_ref[...], sel_ref[...],
                   preferred_element_type=jnp.float32)          # (nb, 20)
    gene = gsel[:, :GENE_DIM]

    # ---- interp: pSp.edit_gene (topk=1, idx=None); torch.argmax over the 2
    # class logits == strict-greater select (ties -> class 0) ------------------
    if interp:
        logits = gene[:, GENE_NUM:]                             # (nb, 2)
        m = logits[:, 1:2] > logits[:, 0:1]                     # (nb, 1) bool
        e0 = jnp.maximum(gsel[:, GENE_DIM:GENE_DIM + GENE_NUM], 0.0)
        e1 = jnp.maximum(gsel[:, GENE_DIM + GENE_NUM:SEL_COLS], 0.0)
        gene = jnp.concatenate([jnp.where(m, e1, e0), logits], axis=1)

    gene_bf = gene.astype(jnp.bfloat16)

    # ---- encoder: spatial mean folded into the weight; bias folded via the
    # ones column -> one (nb, 1033) @ (1033, 512) bf16 matmul ------------------
    # TODO(synk): real Encoder is a conv trunk; stand-in keeps (x, gene)->codes.
    if input_code:
        codes_flat = x_ref[...]                                 # (nb, 512)
    else:
        enc_in = jnp.concatenate(
            [x_ref[...].astype(jnp.bfloat16), gene_bf, ones_col], axis=1)
        h = jnp.dot(enc_in, w_enc_ref[...], preferred_element_type=jnp.float32)
        codes_flat = jnp.where(h > 0.0, h, 0.2 * h)             # leaky relu
    codes_ref[...] = codes_flat                                 # lane-dense (nb, 512)

    # ---- decoder.mapping(randn(B, Z), gene): z supplied from host ------------
    # TODO(synk): real decoder is StyleGAN3 mapping+synthesis from a checkpoint.
    map_in = jnp.concatenate(
        [z_ref[...].astype(jnp.bfloat16), gene_bf, ones_col], axis=1)
    ds = jnp.dot(map_in, w_map_ref[...], preferred_element_type=jnp.float32)
    ds = jnp.where(ds > 0.0, ds, 0.2 * ds)                      # (nb, W_DIM)

    # ---- synthesis: style-mean + modulation projection merged into ONE
    # block-diagonal matmul, then modulate + image projection ------------------
    sm_in = jnp.concatenate(
        [codes_flat.astype(jnp.bfloat16), ds.astype(jnp.bfloat16)], axis=1)
    sm = jnp.dot(sm_in, w_sm_ref[...], preferred_element_type=jnp.float32)
    style = sm[:, :STYLE_DIM]
    mod = sm[:, STYLE_DIM:]
    img = jnp.dot((style * mod).astype(jnp.bfloat16), w_img_ref[...],
                  preferred_element_type=jnp.float32)           # (nb, IMG_PIX)
    img_ref[...] = jnp.tanh(img)                                # lane-dense (nb, 768)


# ------------------------------ model wrapper --------------------------------
class PSPPallas:
    def __init__(self, key):
        ks = jax.random.split(key, 12)
        s = 0.05
        bf = lambda a: a.astype(jnp.bfloat16)
        f32r = lambda a: a.astype(jnp.bfloat16).astype(jnp.float32)  # bf16-rounded

        # --- encoder stand-in; spatial mean folded into the pixel rows -------
        w_enc_img = f32r(jax.random.normal(ks[0], (C, K_CODES)) * s)
        w_enc_gene = f32r(jax.random.normal(ks[1], (GENE_DIM, K_CODES)) * s)
        b_enc = f32r(jax.random.normal(ks[2], (1, K_CODES)) * s)
        w_enc_pix = jnp.repeat(w_enc_img, H * W, axis=0) / (H * W)     # (1024, 512)
        self.w_enc = bf(jnp.concatenate([w_enc_pix, w_enc_gene, b_enc], 0))
        self.ref_w_enc_img, self.ref_w_enc_gene, self.ref_b_enc = (
            w_enc_img, w_enc_gene, b_enc)

        # --- decoder stand-ins (mapping + synthesis), biases folded ----------
        w_map_z = f32r(jax.random.normal(ks[3], (Z_DIM, W_DIM)) * s)
        w_map_g = f32r(jax.random.normal(ks[4], (GENE_DIM, W_DIM)) * s)
        b_map = f32r(jax.random.normal(ks[5], (1, W_DIM)) * s)
        self.w_map = bf(jnp.concatenate([w_map_z, w_map_g, b_map], 0))  # (73, 32)
        w_mod = f32r(jax.random.normal(ks[6], (W_DIM, STYLE_DIM)) * s)
        w_avg = jnp.tile(jnp.eye(STYLE_DIM), (N_STYLES, 1)) / N_STYLES  # style mean
        w_sm = jnp.zeros((K_CODES + W_DIM, 2 * STYLE_DIM), jnp.float32)
        w_sm = w_sm.at[:K_CODES, :STYLE_DIM].set(w_avg)
        w_sm = w_sm.at[K_CODES:, STYLE_DIM:].set(w_mod)
        self.w_sm = bf(w_sm)                                            # (544, 64)
        self.w_img = bf(jax.random.normal(ks[7], (STYLE_DIM, IMG_PIX)) * s)

        # --- eigen stats; edit folded into constant matrices ------------------
        # TODO(synk): real eigen stats come from torch.load('stats/..._eig.pt').
        q0, _ = jnp.linalg.qr(jax.random.normal(ks[8], (GENE_NUM, GENE_NUM)))
        q1, _ = jnp.linalg.qr(jax.random.normal(ks[9], (GENE_NUM, GENE_NUM)))
        v0 = jnp.sort(jnp.abs(jax.random.normal(ks[10], (GENE_NUM,))))[::-1] + 0.1
        v1 = jnp.sort(jnp.abs(jax.random.normal(ks[11], (GENE_NUM,))))[::-1] + 0.1
        q0, q1 = q0.astype(jnp.float32), q1.astype(jnp.float32)
        v0, v1 = v0.astype(jnp.float32), v1.astype(jnp.float32)
        self.ref_eig_vecs, self.ref_eig_vals = [q0, q1], [v0, v1]

        def edit_mat(vx, valx, vr, valr):        # edit_gene as one matrix
            wei = jnp.ones((GENE_NUM,)).at[0].set(jnp.sqrt(valr[0] / valx[0]))
            return vx @ jnp.diag(wei) @ vr.T
        m0 = edit_mat(q0, v0, q1, v1)            # r = 0 -> eigx=eig[0], eigr=eig[1]
        m1 = edit_mat(q1, v1, q0, v0)            # r = 1
        sel_g = jnp.tile(jnp.eye(GENE_DIM), (G4_D1 * G4_D2, 1))         # (128, 8)
        self.sel = jnp.concatenate(
            [sel_g, sel_g[:, :GENE_NUM] @ m0, sel_g[:, :GENE_NUM] @ m1],
            axis=1).astype(jnp.float32)                                 # (128, 20)

        self._key = jax.random.PRNGKey(1234)     # fallback torch.randn analogue
        self._calls = {}                         # cached pallas_call callables

    # ---- weight-stationary, batch-group-gridded fused call -------------------
    def _get_call(self, nb_pad, xcols, interp, input_code):
        ck = (nb_pad, xcols, bool(interp), bool(input_code))
        fn = self._calls.get(ck)
        if fn is not None:
            return fn
        kernel = functools.partial(_psp_fused_kernel, bool(interp), bool(input_code))
        row = lambda i: (i, 0)
        const2 = lambda i: (0, 0)
        fn = pl.pallas_call(
            kernel,
            grid=(nb_pad // MB,),
            in_specs=[
                pl.BlockSpec((MB, xcols), row),
                pl.BlockSpec((MB, G4_FLAT), row),
                pl.BlockSpec((MB, Z_DIM), row),
                pl.BlockSpec(self.sel.shape, const2),       # weights stay resident
                pl.BlockSpec(self.w_enc.shape, const2),
                pl.BlockSpec(self.w_map.shape, const2),
                pl.BlockSpec(self.w_sm.shape, const2),
                pl.BlockSpec(self.w_img.shape, const2),
            ],
            out_specs=(pl.BlockSpec((MB, IMG_PIX), row),
                       pl.BlockSpec((MB, K_CODES), row)),
            out_shape=(jax.ShapeDtypeStruct((nb_pad, IMG_PIX), jnp.float32),
                       jax.ShapeDtypeStruct((nb_pad, K_CODES), jnp.float32)),
            compiler_params=pltpu.CompilerParams(
                dimension_semantics=("parallel",)),   # no-op on 1-TC v5e/v6e
        )
        self._calls[ck] = fn
        return fn

    # ---- pSp.forward semantics ----
    def forward(self, x, gene, input_code=False, randomize_noise=True,
                return_latents=False, interp=False, shift=None, key=None):
        # TODO(synk): randomize_noise / shift belong to the style2 branch (unused).
        nb = gene.shape[0]
        if gene.ndim == 4:
            gene_flat = gene.reshape(nb, -1).astype(jnp.float32)   # (B, 128) lane-dense
        else:  # already summed: only the first GENE_DIM selector rows are hit
            gene_flat = jnp.pad(gene.astype(jnp.float32),
                                ((0, 0), (0, G4_FLAT - GENE_DIM)))
        x_flat = (x.reshape(nb, K_CODES) if input_code
                  else x.reshape(nb, X_COLS)).astype(jnp.float32)

        if key is None:   # host-side fallback; pass `key` explicitly to stay jittable
            self._key, key = jax.random.split(self._key)

        nb_pad = ((nb + MB - 1) // MB) * MB
        pad = nb_pad - nb
        if pad:
            x_flat = jnp.pad(x_flat, ((0, pad), (0, 0)))
            gene_flat = jnp.pad(gene_flat, ((0, pad), (0, 0)))
        z = jax.random.normal(key, (nb_pad, Z_DIM), jnp.float32)  # torch.randn analogue

        call = self._get_call(nb_pad, x_flat.shape[1], interp, input_code)
        img_flat, codes_flat = call(x_flat, gene_flat, z, self.sel,
                                    self.w_enc, self.w_map, self.w_sm, self.w_img)
        images = img_flat[:nb].reshape(nb, IMG_C, IMG_HW, IMG_HW)
        if return_latents:
            return images, codes_flat[:nb].reshape(nb, N_STYLES, STYLE_DIM)
        return images


# ---------------------- plain-JAX reference (codes path) ---------------------
def _codes_ref(model, x, gene4, interp):
    gene = gene4.astype(jnp.float32).sum((1, 2))
    if interp:
        g = gene[:, :GENE_NUM]
        rows = []
        for i in range(gene.shape[0]):
            r = int(jnp.argmax(gene[i, GENE_NUM:]))
            vecx, valx = model.ref_eig_vecs[r], model.ref_eig_vals[r]
            vecr, valr = model.ref_eig_vecs[(r + 1) % 2], model.ref_eig_vals[(r + 1) % 2]
            xedt = g[i] @ vecx
            wei = jnp.ones((GENE_NUM,)).at[0].set(jnp.sqrt(valr[0] / valx[0]))
            xedt = (wei * xedt) @ vecr.T
            rows.append(jnp.maximum(xedt, 0.0))
        gene = gene.at[:, :GENE_NUM].set(jnp.stack(rows))
    pooled = x.mean((2, 3))
    enc_in = jnp.concatenate([pooled, gene], axis=1)
    w = jnp.concatenate([model.ref_w_enc_img, model.ref_w_enc_gene], 0)
    h = enc_in @ w + model.ref_b_enc
    return jnp.where(h > 0, h, 0.2 * h)


# --------------------------------- main --------------------------------------
if __name__ == "__main__":
    key = jax.random.PRNGKey(0)
    kx, kg, kp, kz = jax.random.split(key, 4)
    x = jax.random.normal(kx, (B, C, H, W), jnp.float32)
    gene4 = jnp.abs(jax.random.normal(kg, (B, G4_D1, G4_D2, GENE_DIM), jnp.float32))

    model = PSPPallas(kp)
    images, codes = model.forward(x, gene4, return_latents=True, interp=True, key=kz)
    jax.block_until_ready((images, codes))

    assert images.shape == (B, IMG_C, IMG_HW, IMG_HW)
    assert codes.shape == (B, N_STYLES, STYLE_DIM)
    assert bool(jnp.all(jnp.isfinite(images)))
    assert bool(jnp.all(jnp.isfinite(codes)))

    # deterministic (gene-edit + encoder) path checked against a plain-JAX
    # reference; the image path consumes random z so it is checked for
    # shape/finiteness only.
    ref = _codes_ref(model, x, gene4, interp=True)
    got = codes.reshape(B, K_CODES)
    rel = float(jnp.linalg.norm(got - ref) / jnp.linalg.norm(ref))
    assert rel < 5e-2, f"codes mismatch vs reference: rel err {rel}"

    # also exercise the non-interp variant (uses the cached call machinery)
    images2 = model.forward(x, gene4, interp=False)
    jax.block_until_ready(images2)
    assert images2.shape == (B, IMG_C, IMG_HW, IMG_HW)
    assert bool(jnp.all(jnp.isfinite(images2)))

    print("KERNEL_OK")
</pallas_src>

<mosaic_0001>
module attributes {stable_mosaic.version = 11 : i64} {
  func.func @_psp_fused_kernel(%arg0: i32, %arg1: memref<8x1024xf32, #tpu.memory_space<vmem>>, %arg2: memref<8x128xf32, #tpu.memory_space<vmem>>, %arg3: memref<8x64xf32, #tpu.memory_space<vmem>>, %arg4: memref<128x20xf32, #tpu.memory_space<vmem>>, %arg5: memref<1033x512xbf16, #tpu.memory_space<vmem>>, %arg6: memref<73x32xbf16, #tpu.memory_space<vmem>>, %arg7: memref<544x64xbf16, #tpu.memory_space<vmem>>, %arg8: memref<32x768xbf16, #tpu.memory_space<vmem>>, %arg9: memref<8x768xf32, #tpu.memory_space<vmem>>, %arg10: memref<8x512xf32, #tpu.memory_space<vmem>>) attributes {dimension_semantics = [#tpu.dimension_semantics<parallel>], iteration_bounds = array<i64: 1>, scalar_prefetch = 0 : i64, scratch_operands = 0 : i64, tpu.core_type = #tpu.core_type<tc>, window_params = [{transform_indices = @transform_0, window_bounds = array<i64: 8, 1024>}, {transform_indices = @transform_1, window_bounds = array<i64: 8, 128>}, {transform_indices = @transform_2, window_bounds = array<i64: 8, 64>}, {pipeline_mode = #tpu.pipeline_mode<synchronous>, transform_indices = @transform_3, window_bounds = array<i64: 128, 20>}, {pipeline_mode = #tpu.pipeline_mode<synchronous>, transform_indices = @transform_4, window_bounds = array<i64: 1033, 512>}, {pipeline_mode = #tpu.pipeline_mode<synchronous>, transform_indices = @transform_5, window_bounds = array<i64: 73, 32>}, {pipeline_mode = #tpu.pipeline_mode<synchronous>, transform_indices = @transform_6, window_bounds = array<i64: 544, 64>}, {pipeline_mode = #tpu.pipeline_mode<synchronous>, transform_indices = @transform_7, window_bounds = array<i64: 32, 768>}, {transform_indices = @transform_8, window_bounds = array<i64: 8, 768>}, {transform_indices = @transform_9, window_bounds = array<i64: 8, 512>}]} {
    %cst = arith.constant 1.000000e+00 : bf16
    %0 = vector.broadcast %cst : bf16 to vector<8x1xbf16>
    %c0 = arith.constant 0 : index
    %c0_0 = arith.constant 0 : index
    %1 = vector.load %arg2[%c0, %c0_0] : memref<8x128xf32, #tpu.memory_space<vmem>>, vector<8x128xf32>
    %c0_1 = arith.constant 0 : index
    %c0_2 = arith.constant 0 : index
    %2 = vector.load %arg4[%c0_1, %c0_2] : memref<128x20xf32, #tpu.memory_space<vmem>>, vector<128x20xf32>
    %cst_3 = arith.constant dense<0.000000e+00> : vector<8x20xf32>
    %3 = tpu.matmul %1, %2, %cst_3 {dimension_numbers = #tpu.dot_dimension_numbers<[1], [0], [0], [1], [0, 0, 1, 1], [], []>} : vector<8x128xf32>, vector<128x20xf32>, vector<8x20xf32> -> vector<8x20xf32>
    %4 = vector.extract_strided_slice %3 {offsets = [0, 0], sizes = [8, 8], strides = [1, 1]} : vector<8x20xf32> to vector<8x8xf32>
    %5 = vector.extract_strided_slice %4 {offsets = [0, 6], sizes = [8, 2], strides = [1, 1]} : vector<8x8xf32> to vector<8x2xf32>
    %6 = vector.extract_strided_slice %5 {offsets = [0, 1], sizes = [8, 1], strides = [1, 1]} : vector<8x2xf32> to vector<8x1xf32>
    %7 = vector.extract_strided_slice %5 {offsets = [0, 0], sizes = [8, 1], strides = [1, 1]} : vector<8x2xf32> to vector<8x1xf32>
    %8 = arith.cmpf ogt, %6, %7 : vector<8x1xf32>
    %9 = vector.extract_strided_slice %3 {offsets = [0, 8], sizes = [8, 6], strides = [1, 1]} : vector<8x20xf32> to vector<8x6xf32>
    %cst_4 = arith.constant 0.000000e+00 : f32
    %10 = vector.broadcast %cst_4 : f32 to vector<8x6xf32>
    %11 = arith.maximumf %9, %10 : vector<8x6xf32>
    %12 = vector.extract_strided_slice %3 {offsets = [0, 14], sizes = [8, 6], strides = [1, 1]} : vector<8x20xf32> to vector<8x6xf32>
    %cst_5 = arith.constant 0.000000e+00 : f32
    %13 = vector.broadcast %cst_5 : f32 to vector<8x6xf32>
    %14 = arith.maximumf %12, %13 : vector<8x6xf32>
    %15 = vector.shape_cast %8 : vector<8x1xi1> to vector<8x1xi1>
    %16 = vector.broadcast %15 : vector<8x1xi1> to vector<8x6xi1>
    %17 = arith.select %16, %14, %11 : vector<8x6xi1>, vector<8x6xf32>
    %18 = tpu.concatenate %17, %5 in 1 : vector<8x6xf32>, vector<8x2xf32> -> vector<8x8xf32>
    %19 = arith.truncf %18 : vector<8x8xf32> to vector<8x8xbf16>
    %c0_6 = arith.constant 0 : index
    %c0_7 = arith.constant 0 : index
    %20 = vector.load %arg1[%c0_6, %c0_7] : memref<8x1024xf32, #tpu.memory_space<vmem>>, vector<8x1024xf32>
    %21 = arith.truncf %20 : vector<8x1024xf32> to vector<8x1024xbf16>
    %22 = tpu.concatenate %21, %19, %0 in 1 : vector<8x1024xbf16>, vector<8x8xbf16>, vector<8x1xbf16> -> vector<8x1033xbf16>
    %c0_8 = arith.constant 0 : index
    %c0_9 = arith.constant 0 : index
    %23 = vector.load %arg5[%c0_8, %c0_9] : memref<1033x512xbf16, #tpu.memory_space<vmem>>, vector<1033x512xbf16>
    %cst_10 = arith.constant dense<0.000000e+00> : vector<8x512xf32>
    %24 = tpu.matmul %22, %23, %cst_10 {dimension_numbers = #tpu.dot_dimension_numbers<[1], [0], [0], [1], [0, 0, 1, 1], [], []>} : vector<8x1033xbf16>, vector<1033x512xbf16>, vector<8x512xf32> -> vector<8x512xf32>
    %cst_11 = arith.constant 0.000000e+00 : f32
    %25 = vector.broadcast %cst_11 : f32 to vector<8x512xf32>
    %26 = arith.cmpf ogt, %24, %25 : vector<8x512xf32>
    %cst_12 = arith.constant 2.000000e-01 : f32
    %27 = vector.broadcast %cst_12 : f32 to vector<8x512xf32>
    %28 = arith.mulf %27, %24 : vector<8x512xf32>
    %29 = arith.select %26, %24, %28 : vector<8x512xi1>, vector<8x512xf32>
    %c0_13 = arith.constant 0 : index
    %c0_14 = arith.constant 0 : index
    %30 = vector.load %arg10[%c0_13, %c0_14] : memref<8x512xf32, #tpu.memory_space<vmem>>, vector<8x512xf32>
    tpu.vector_store %arg10[%c0_13, %c0_14], %29 {strides = array<i32>} : memref<8x512xf32, #tpu.memory_space<vmem>>, vector<8x512xf32>,
    %c0_15 = arith.constant 0 : index
    %c0_16 = arith.constant 0 : index
    %31 = vector.load %arg3[%c0_15, %c0_16] : memref<8x64xf32, #tpu.memory_space<vmem>>, vector<8x64xf32>
    %32 = arith.truncf %31 : vector<8x64xf32> to vector<8x64xbf16>
    %33 = tpu.concatenate %32, %19, %0 in 1 : vector<8x64xbf16>, vector<8x8xbf16>, vector<8x1xbf16> -> vector<8x73xbf16>
    %c0_17 = arith.constant 0 : index
    %c0_18 = arith.constant 0 : index
    %34 = vector.load %arg6[%c0_17, %c0_18] : memref<73x32xbf16, #tpu.memory_space<vmem>>, vector<73x32xbf16>
    %cst_19 = arith.constant dense<0.000000e+00> : vector<8x32xf32>
    %35 = tpu.matmul %33, %34, %cst_19 {dimension_numbers = #tpu.dot_dimension_numbers<[1], [0], [0], [1], [0, 0, 1, 1], [], []>} : vector<8x73xbf16>, vector<73x32xbf16>, vector<8x32xf32> -> vector<8x32xf32>
    %cst_20 = arith.constant 0.000000e+00 : f32
    %36 = vector.broadcast %cst_20 : f32 to vector<8x32xf32>
    %37 = arith.cmpf ogt, %35, %36 : vector<8x32xf32>
    %cst_21 = arith.constant 2.000000e-01 : f32
    %38 = vector.broadcast %cst_21 : f32 to vector<8x32xf32>
    %39 = arith.mulf %38, %35 : vector<8x32xf32>
    %40 = arith.select %37, %35, %39 : vector<8x32xi1>, vector<8x32xf32>
    %41 = arith.truncf %29 : vector<8x512xf32> to vector<8x512xbf16>
    %42 = arith.truncf %40 : vector<8x32xf32> to vector<8x32xbf16>
    %43 = tpu.concatenate %41, %42 in 1 : vector<8x512xbf16>, vector<8x32xbf16> -> vector<8x544xbf16>
    %c0_22 = arith.constant 0 : index
    %c0_23 = arith.constant 0 : index
    %44 = vector.load %arg7[%c0_22, %c0_23] : memref<544x64xbf16, #tpu.memory_space<vmem>>, vector<544x64xbf16>
    %cst_24 = arith.constant dense<0.000000e+00> : vector<8x64xf32>
    %45 = tpu.matmul %43, %44, %cst_24 {dimension_numbers = #tpu.dot_dimension_numbers<[1], [0], [0], [1], [0, 0, 1, 1], [], []>} : vector<8x544xbf16>, vector<544x64xbf16>, vector<8x64xf32> -> vector<8x64xf32>
    %46 = vector.extract_strided_slice %45 {offsets = [0, 0], sizes = [8, 32], strides = [1, 1]} : vector<8x64xf32> to vector<8x32xf32>
    %47 = vector.extract_strided_slice %45 {offsets = [0, 32], sizes = [8, 32], strides = [1, 1]} : vector<8x64xf32> to vector<8x32xf32>
    %48 = arith.mulf %46, %47 : vector<8x32xf32>
    %49 = arith.truncf %48 : vector<8x32xf32> to vector<8x32xbf16>
    %c0_25 = arith.constant 0 : index
    %c0_26 = arith.constant 0 : index
    %50 = vector.load %arg8[%c0_25, %c0_26] : memref<32x768xbf16, #tpu.memory_space<vmem>>, vector<32x768xbf16>
    %cst_27 = arith.constant dense<0.000000e+00> : vector<8x768xf32>
    %51 = tpu.matmul %49, %50, %cst_27 {dimension_numbers = #tpu.dot_dimension_numbers<[1], [0], [0], [1], [0, 0, 1, 1], [], []>} : vector<8x32xbf16>, vector<32x768xbf16>, vector<8x768xf32> -> vector<8x768xf32>
    %52 = math.tanh %51 : vector<8x768xf32>
    %c0_28 = arith.constant 0 : index
    %c0_29 = arith.constant 0 : index
    %53 = vector.load %arg9[%c0_28, %c0_29] : memref<8x768xf32, #tpu.memory_space<vmem>>, vector<8x768xf32>
    tpu.vector_store %arg9[%c0_28, %c0_29], %52 {strides = array<i32>} : memref<8x768xf32, #tpu.memory_space<vmem>>, vector<8x768xf32>,
    return
  }
  func.func @transform_0(%arg0: i32) -> (i32, i32) {
    %c0_i32 = arith.constant 0 : i32
    %c0_i32_0 = arith.constant 0 : i32
    return %arg0, %c0_i32 : i32, i32
  }
  func.func @transform_1(%arg0: i32) -> (i32, i32) {
    %c0_i32 = arith.constant 0 : i32
    %c0_i32_0 = arith.constant 0 : i32
    return %arg0, %c0_i32 : i32, i32
  }
  func.func @transform_2(%arg0: i32) -> (i32, i32) {
    %c0_i32 = arith.constant 0 : i32
    %c0_i32_0 = arith.constant 0 : i32
    return %arg0, %c0_i32 : i32, i32
  }
  func.func @transform_3(%arg0: i32) -> (i32, i32) {
    %c0_i32 = arith.constant 0 : i32
    %c0_i32_0 = arith.constant 0 : i32
    %c0_i32_1 = arith.constant 0 : i32
    return %c0_i32, %c0_i32_0 : i32, i32
  }
  func.func @transform_4(%arg0: i32) -> (i32, i32) {
    %c0_i32 = arith.constant 0 : i32
    %c0_i32_0 = arith.constant 0 : i32
    %c0_i32_1 = arith.constant 0 : i32
    return %c0_i32, %c0_i32_0 : i32, i32
  }
  func.func @transform_5(%arg0: i32) -> (i32, i32) {
    %c0_i32 = arith.constant 0 : i32
    %c0_i32_0 = arith.constant 0 : i32
    %c0_i32_1 = arith.constant 0 : i32
    return %c0_i32, %c0_i32_0 : i32, i32
  }
  func.func @transform_6(%arg0: i32) -> (i32, i32) {
    %c0_i32 = arith.constant 0 : i32
    %c0_i32_0 = arith.constant 0 : i32
    %c0_i32_1 = arith.constant 0 : i32
    return %c0_i32, %c0_i32_0 : i32, i32
  }
  func.func @transform_7(%arg0: i32) -> (i32, i32) {
    %c0_i32 = arith.constant 0 : i32
    %c0_i32_0 = arith.constant 0 : i32
    %c0_i32_1 = arith.constant 0 : i32
    return %c0_i32, %c0_i32_0 : i32, i32
  }
  func.func @transform_8(%arg0: i32) -> (i32, i32) {
    %c0_i32 = arith.constant 0 : i32
    %c0_i32_0 = arith.constant 0 : i32
    return %arg0, %c0_i32 : i32, i32
  }
  func.func @transform_9(%arg0: i32) -> (i32, i32) {
    %c0_i32 = arith.constant 0 : i32
    %c0_i32_0 = arith.constant 0 : i32
    return %arg0, %c0_i32 : i32, i32
  }
}

</mosaic_0001>

<bundles_post_ra>
// kernel: tpu_custom_call.1
= control target key start
LH: loop header
LB: loop body
LE: loop exit
PB: predicated region body
PF: predicated region fallthrough
CT: control target
= control target key end

     0   :  { %15 = vsyncpa [#allocation3], 0  ;;  %s4414_s0 = inlined_call_operand.hbm [shape: f32[8,1024], index: 0, kind: input, shape index: {}]   ;;  %s4415_s1 = inlined_call_operand.hbm [shape: f32[8,128], index: 1, kind: input, shape index: {}]   ;;  %s4416_s2 = inlined_call_operand.hbm [shape: f32[8,64], index: 2, kind: input, shape index: {}]   ;;  %s4417_s3 = inlined_call_operand.vmem [shape: f32[128,20], index: 3, kind: input, shape index: {}]   ;;  %s4418_s4 = inlined_call_operand.hbm [shape: bf16[1033,512], index: 4, kind: input, shape index: {}]   ;;  %s4419_s5 = inlined_call_operand.vmem [shape: bf16[73,32], index: 5, kind: input, shape index: {}]   ;;  %s4420_s6 = inlined_call_operand.vmem [shape: bf16[544,64], index: 6, kind: input, shape index: {}]   ;;  %s4421_s7 = inlined_call_operand.hbm [shape: bf16[32,768], index: 7, kind: input, shape index: {}]   ;;  %s4422_s8 = inlined_call_operand.hbm [shape: f32[8,768], index: 8, kind: output, shape index: {0}]   ;;  %s4423_s9 = inlined_call_operand.hbm [shape: f32[8,512], index: 9, kind: output, shape index: {1}]  }
   0x1   :  { %16 = vsyncpa [#allocation6], 0 }
   0x2   :  { %17 = vsyncpa [#allocation9], 0 }
   0x3   :  { %18 = vsyncpa [#allocation4], 0 }
   0x4   :  { %19 = vsyncpa [#allocation13], 0  ;;  %s4051_s30 = smov [#allocation5]   ;;  %s4052_s11 = smov [#allocation8]  }
   0x5   :  { %s36_s10 = sshll.u32 %s4051_s30, 4  ;;  %s57_s12 = sshll.u32 %s4052_s11, 4  ;;  %s37_s10 = int_to_ptr.vmem [resolvable:$true] %s36_s10  ;;  %s58_s12 = int_to_ptr.vmem [resolvable:$true] %s57_s12 }
   0x6   :  { %s3909_s13 = scalar_lea.vmem %s37_s10, 128  ;;  %p3914_p1 = scmp.lt.s32.totalorder %s37_s10, %s37_s10 }
   0x7   :  { %p3910_p0 = scmp.ne.s32.totalorder %s37_s10, %s3909_s13  ;;  %p3915_p2 = scmp.lt.s32.totalorder %s3909_s13, %s3909_s13 }
   0x9   :  { %p3916_p3 = por %p3915_p2, %p3914_p1 }
   0xb   :  { %p3917_p4 = pnand %p3916_p3, %p3910_p0 }
   0xd   :  { %3920 = shalt.err (!%p3917_p4)
}
   0xe   :  { %39 = dma.hbm_to_vmem [thread:$0]  %s4415_s1, 128, %s37_s10, [#allocation6]  }
   0xf   :  { %s3929_s16 = scalar_lea.vmem %s58_s12, 33280  ;;  %p3934_p6 = scmp.lt.s32.totalorder %s58_s12, %s58_s12 }
  0x10   :  { %p3930_p5 = scmp.ne.s32.totalorder %s58_s12, %s3929_s16  ;;  %p3935_p7 = scmp.lt.s32.totalorder %s3929_s16, %s3929_s16 }
  0x12   :  { %p3936_p8 = por %p3935_p7, %p3934_p6 }
  0x14   :  { %p3937_p9 = pnand %p3936_p8, %p3930_p5 }
  0x16   :  { %3940 = shalt.err (!%p3937_p9)
}
  0x17   :  { %s4053_s17 = smov 256   ;;  %s4054_s18 = smov 16  }
  0x18   :  { %63 = dma.hbm_to_vmem [thread:$0]  %s4418_s4, 33280, %s58_s12, [#allocation9], %s4053_s17, %s4053_s17, %s4054_s18  }
  0x19   :  { %s4055_s21 = smov [#allocation2]   ;;  %s4056_s23 = smov [#allocation7]  }
  0x1a   :  { %s26_s22 = sshll.u32 %s4055_s21, 4  ;;  %s46_s24 = sshll.u32 %s4056_s23, 4  ;;  %s27_s22 = int_to_ptr.vmem [resolvable:$true] %s26_s22  ;;  %s47_s24 = int_to_ptr.vmem [resolvable:$true] %s46_s24 }
  0x1b   :  { %s3949_s1 = scalar_lea.vmem %s27_s22, 1024  ;;  %p3954_p11 = scmp.lt.s32.totalorder %s27_s22, %s27_s22 }
  0x1c   :  { %p3950_p10 = scmp.ne.s32.totalorder %s27_s22, %s3949_s1  ;;  %p3955_p12 = scmp.lt.s32.totalorder %s3949_s1, %s3949_s1 }
  0x1e   :  { %p3956_p13 = por %p3955_p12, %p3954_p11 }
  0x20   :  { %p3957_p0 = pnand %p3956_p13, %p3950_p10 }
  0x22   :  { %3960 = shalt.err (!%p3957_p0)
}
  0x23   :  { %29 = dma.hbm_to_vmem [thread:$0]  %s4414_s0, 1024, %s27_s22, [#allocation3]  }
  0x24   :  { %s3969_s27 = scalar_lea.vmem %s47_s24, 128  ;;  %p3974_p2 = scmp.lt.s32.totalorder %s47_s24, %s47_s24 }
  0x25   :  { %p3970_p1 = scmp.ne.s32.totalorder %s47_s24, %s3969_s27  ;;  %p3975_p3 = scmp.lt.s32.totalorder %s3969_s27, %s3969_s27 }
  0x27   :  { %p3976_p4 = por %p3975_p3, %p3974_p2 }
  0x29   :  { %p3977_p5 = pnand %p3976_p4, %p3970_p1 }
  0x2b   :  { %3980 = shalt.err (!%p3977_p5)
}
  0x2c   :  { %49 = dma.hbm_to_vmem [thread:$0]  %s4416_s2, 128, %s47_s24, [#allocation6]  }
  0x2d   :  { %s4057_s29 = smov [#allocation10]  }
  0x2e   :  { %s73_s30 = sshll.u32 %s4057_s29, 4  ;;  %s74_s30 = int_to_ptr.vmem [resolvable:$true] %s73_s30 }
  0x2f   :  { %s3989_s10 = scalar_lea.vmem %s74_s30, 1536  ;;  %p3994_p7 = scmp.lt.s32.totalorder %s74_s30, %s74_s30 }
  0x30   :  { %p3990_p6 = scmp.ne.s32.totalorder %s74_s30, %s3989_s10  ;;  %p3995_p8 = scmp.lt.s32.totalorder %s3989_s10, %s3989_s10 }
  0x32   :  { %p3996_p9 = por %p3995_p8, %p3994_p7 }
  0x34   :  { %p3997_p10 = pnand %p3996_p9, %p3990_p6 }
  0x36   :  { %4000 = shalt.err (!%p3997_p10)
}
  0x37   :  { %s4058_s0 = smov 384   ;;  %s4059_s11 = smov 24  }
  0x38   :  { %79 = dma.hbm_to_vmem [thread:$0]  %s4421_s7, 1536, %s74_s30, [#allocation9], %s4058_s0, %s4058_s0, %s4059_s11  }
  0x39   :  { %4041 = dma.done.wait [#allocation3], 1024  }
  0x3a   :  { %4042 = vsyncadd [#allocation3], 4294966272 }
  0x3b   :  { %4043 = dma.done.wait [#allocation6], 256  }
  0x3c   :  { %4044 = vsyncadd [#allocation6], 4294967040 }
  0x3d   :  { %4045 = dma.done.wait [#allocation9], 34816  }
  0x3e   :  { %4046 = vsyncadd [#allocation9], 4294932480  ;;  %v4060_v0 = vmov 0.0   ;;  %vm4061_vm0 = vmmov 0   ;;  %v113_v1 = vld [vmem:[%s4417_s3 + $0x78] sm:$0xff]  ;;  %v112_v2 = vld [vmem:[%s4417_s3 + $0x70] sm:$0xff] }
  0x3f   :  { %3363 = vmatprep.subr.mxu0 %v4060_v0  ;;  %3395 = vmatprep.mubr.msk.f32.mxu0 %vm4061_vm0, %v4060_v0  ;;  %v111_v3 = vld [vmem:[%s4417_s3 + $0x68] sm:$0xff]  ;;  %v110_v4 = vld [vmem:[%s4417_s3 + $0x60] sm:$0xff]  ;;  %v109_v5 = vld [vmem:[%s4417_s3 + $0x58] sm:$0xff]  ;;  %v4062_v18 = vmov 7   ;;  %s4064_s18 = smov 6   ;;  %vm1786_vm2 = vcmask 1043456  }
  0x40   :  { %3364 = vmatpush3.msra.mxu0 %v113_v1  ;;  %v108_v6 = vld [vmem:[%s4417_s3 + $0x50] sm:$0xff]  ;;  %v107_v7 = vld [vmem:[%s4417_s3 + $0x48] sm:$0xff]  ;;  %v106_v8 = vld [vmem:[%s4417_s3 + $0x40] sm:$0xff]  ;;  %3441 = vset.pattern.permute.xlu0 %v4062_v18  ;;  %vm1787_vm3 = vcmask 1044480   ;;  %s4067_s19 = smov 114   ;;  %vm204_vm5 = vcmask 48128  }
  0x41   :  { %3365 = vmatprep.subr.mxu0 %v4060_v0  ;;  %v105_v9 = vld [vmem:[%s4417_s3 + $0x38] sm:$0xff]  ;;  %v104_v10 = vld [vmem:[%s4417_s3 + $0x30] sm:$0xff]  ;;  %v103_v11 = vld [vmem:[%s4417_s3 + $0x28] sm:$0xff]  ;;  %vm223_vm6 = vcmask 64512   ;;  %vm1783_vm7 = vcmask 72704   ;;  %s4068_s20 = smov 64  }
  0x42   :  { %3366 = vmatpush3.msra.mxu0 %v112_v2  ;;  %v102_v12 = vld [vmem:[%s4417_s3 + $0x20] sm:$0xff]  ;;  %v101_v13 = vld [vmem:[%s4417_s3 + $0x18] sm:$0xff]  ;;  %v100_v14 = vld [vmem:[%s4417_s3 + $0x10] sm:$0xff]  ;;  %vm2233_vm8 = vcmask 523264   ;;  %vm2237_vm9 = vcmask 588800   ;;  %vm2278_vm10 = vcmask 596992  }
  0x43   :  { %3367 = vmatprep.subr.mxu0 %v4060_v0  ;;  %v99_v15 = vld [vmem:[%s4417_s3 + $0x8] sm:$0xff]  ;;  %v98_v16 = vld [vmem:[%s4417_s3] sm:$0xff]  ;;  %s4063_s3 = smov 1   ;;  %v210_v50 = vld [vmem:[#allocation2 + $0x18] sm:$0xff]  ;;  %s4070_s17 = smov [#allocation12]  }
  0x44   :  { %3368 = vmatpush3.msra.mxu0 %v111_v3  ;;  %v97_v17 = vld [vmem:[#allocation5] sm:$0xff]  ;;  %v208_v36 = vld [vmem:[#allocation2 + $0x8] sm:$0xff]  ;;  %v4212_v52 = vpack.c.bf16 %v210_v50, %v210_v50 }
  0x45   :  { %3369 = vmatprep.subr.mxu0 %v4060_v0  ;;  %v3442_v19 = vld [vmem:[#allocation8 + $0xe4] ss:$16 sps:$4 sm:$0xff]   ;;  %v3444_v20 = vld [vmem:[#allocation8 + $0xe0] ss:$16 sps:$4 sm:$0xff]   ;;  %v4207_v40 = vpack.c.bf16 %v208_v36, %v208_v36 }
  0x46   :  { %3370 = vmatpush3.msra.mxu0 %v110_v4  ;;  %v3445_v21 = vld [vmem:[#allocation8 + $0x2e0] ss:$16 sps:$4 sm:$0xff]   ;;  %v3447_v22 = vld [vmem:[#allocation8 + $0x2e4] ss:$16 sps:$4 sm:$0xff]   ;;  %1802 = vmatprep.subr.bf16.mxu1 %v3442_v19 }
  0x47   :  { %3371 = vmatprep.subr.mxu0 %v4060_v0  ;;  %v3448_v23 = vld [vmem:[#allocation8 + $0xc4] ss:$16 sps:$4 sm:$0xff]   ;;  %1803 = vmatpush1.bf16.msra.mxu1 %v3444_v20  ;;  %v3450_v25 = vld [vmem:[#allocation8 + $0xc0] ss:$16 sps:$4 sm:$0xff]  }
  0x48   :  { %3372 = vmatpush3.msra.mxu0 %v109_v5  ;;  %v3453_v24 = vld [vmem:[#allocation8 + $0x2c4] ss:$16 sps:$4 sm:$0xff]   ;;  %1804 = vmatprep.subr.bf16.mxu1 %v3448_v23  ;;  %v3451_v26 = vld [vmem:[#allocation8 + $0x2c0] ss:$16 sps:$4 sm:$0xff]  }
  0x49   :  { %3373 = vmatprep.subr.mxu0 %v4060_v0  ;;  %v3454_v27 = vld [vmem:[#allocation8 + $0xa4] ss:$16 sps:$4 sm:$0xff]   ;;  %v3456_v29 = vld [vmem:[#allocation8 + $0xa0] ss:$16 sps:$4 sm:$0xff]   ;;  %1834 = vmatprep.mubr.bf16.mxu1 %v4207_v40 }
  0x4a   :  { %3374 = vmatpush3.msra.mxu0 %v108_v6  ;;  %v3459_v28 = vld [vmem:[#allocation8 + $0x2a4] ss:$16 sps:$4 sm:$0xff]   ;;  %v3457_v30 = vld [vmem:[#allocation8 + $0x2a0] ss:$16 sps:$4 sm:$0xff]  }
  0x4b   :  { %3375 = vmatprep.subr.mxu0 %v4060_v0  ;;  %1805 = vmatpush1.bf16.msra.mxu1 %v3450_v25  ;;  %v3460_v31 = vld [vmem:[#allocation8 + $0x84] ss:$16 sps:$4 sm:$0xff]   ;;  %v3462_v35 = vld [vmem:[#allocation8 + $0x80] ss:$16 sps:$4 sm:$0xff]  }
  0x4c   :  { %3376 = vmatpush3.msra.mxu0 %v107_v7  ;;  %1806 = vmatprep.subr.bf16.mxu1 %v3454_v27  ;;  %v3465_v32 = vld [vmem:[#allocation8 + $0x284] ss:$16 sps:$4 sm:$0xff]   ;;  %v3463_v38 = vld [vmem:[#allocation8 + $0x280] ss:$16 sps:$4 sm:$0xff]  }
  0x4d   :  { %3377 = vmatprep.subr.mxu0 %v4060_v0  ;;  %v3466_v39 = vld [vmem:[#allocation8 + $0x64] ss:$16 sps:$4 sm:$0xff]   ;;  %v3468_v42 = vld [vmem:[#allocation8 + $0x60] ss:$16 sps:$4 sm:$0xff]  }
  0x4e   :  { %3378 = vmatpush3.msra.mxu0 %v106_v8  ;;  %v3471_v41 = vld [vmem:[#allocation8 + $0x264] ss:$16 sps:$4 sm:$0xff]   ;;  %v3469_v43 = vld [vmem:[#allocation8 + $0x260] ss:$16 sps:$4 sm:$0xff]  }
  0x4f   :  { %3379 = vmatprep.subr.mxu0 %v4060_v0  ;;  %1807 = vmatpush1.bf16.msra.mxu1 %v3456_v29  ;;  %v3472_v44 = vld [vmem:[#allocation8 + $0x44] ss:$16 sps:$4 sm:$0xff]   ;;  %v3474_v46 = vld [vmem:[#allocation8 + $0x40] ss:$16 sps:$4 sm:$0xff]  }
  0x50   :  { %3380 = vmatpush3.msra.mxu0 %v105_v9  ;;  %1808 = vmatprep.subr.bf16.mxu1 %v3460_v31  ;;  %v3477_v45 = vld [vmem:[#allocation8 + $0x244] ss:$16 sps:$4 sm:$0xff]   ;;  %v3475_v47 = vld [vmem:[#allocation8 + $0x240] ss:$16 sps:$4 sm:$0xff]  }
  0x51   :  { %3381 = vmatprep.subr.mxu0 %v4060_v0  ;;  %v3478_v48 = vld [vmem:[#allocation8 + $0x24] ss:$16 sps:$4 sm:$0xff]   ;;  %v3480_v51 = vld [vmem:[#allocation8 + $0x20] ss:$16 sps:$4 sm:$0xff]  }
  0x52   :  { %3382 = vmatpush3.msra.mxu0 %v104_v10  ;;  %v3483_v49 = vld [vmem:[#allocation8 + $0x224] ss:$16 sps:$4 sm:$0xff]   ;;  %v3481_v53 = vld [vmem:[#allocation8 + $0x220] ss:$16 sps:$4 sm:$0xff]  }
  0x53   :  { %3383 = vmatprep.subr.mxu0 %v4060_v0  ;;  %1809 = vmatpush1.bf16.msra.mxu1 %v3462_v35  ;;  %v3484_v54 = vld [vmem:[#allocation8 + $0x4] ss:$16 sps:$4 sm:$0xff]   ;;  %v3486_v56 = vld [vmem:[#allocation8] ss:$16 sps:$4 sm:$0xff]  }
  0x54   :  { %3384 = vmatpush3.msra.mxu0 %v103_v11  ;;  %1810 = vmatprep.subr.bf16.mxu1 %v3466_v39  ;;  %v3489_v55 = vld [vmem:[#allocation8 + $0x204] ss:$16 sps:$4 sm:$0xff]   ;;  %v3487_v57 = vld [vmem:[#allocation8 + $0x200] ss:$16 sps:$4 sm:$0xff]  }
  0x55   :  { %3385 = vmatprep.subr.mxu0 %v4060_v0  ;;  %v3490_v58 = vld [vmem:[#allocation8 + $0x1e4] ss:$16 sps:$4 sm:$0xff]   ;;  %v3492_v60 = vld [vmem:[#allocation8 + $0x1e0] ss:$16 sps:$4 sm:$0xff]  }
  0x56   :  { %3386 = vmatpush3.msra.mxu0 %v102_v12  ;;  %v3495_v59 = vld [vmem:[#allocation8 + $0x3e4] ss:$16 sps:$4 sm:$0xff]   ;;  %v3493_v61 = vld [vmem:[#allocation8 + $0x3e0] ss:$16 sps:$4 sm:$0xff]  }
  0x57   :  { %3387 = vmatprep.subr.mxu0 %v4060_v0  ;;  %1811 = vmatpush1.bf16.msra.mxu1 %v3468_v42  ;;  %v3496_v62 = vld [vmem:[#allocation8 + $0x1c4] ss:$16 sps:$4 sm:$0xff]   ;;  %v3498_v1 = vld [vmem:[#allocation8 + $0x1c0] ss:$16 sps:$4 sm:$0xff]  }
  0x58   :  { %3388 = vmatpush3.msra.mxu0 %v101_v13  ;;  %1812 = vmatprep.subr.bf16.mxu1 %v3472_v44  ;;  %v3501_v63 = vld [vmem:[#allocation8 + $0x3c4] ss:$16 sps:$4 sm:$0xff]   ;;  %v3499_v2 = vld [vmem:[#allocation8 + $0x3c0] ss:$16 sps:$4 sm:$0xff]  }
  0x59   :  { %3389 = vmatprep.subr.mxu0 %v4060_v0  ;;  %v3502_v3 = vld [vmem:[#allocation8 + $0x1a4] ss:$16 sps:$4 sm:$0xff]   ;;  %v3504_v5 = vld [vmem:[#allocation8 + $0x1a0] ss:$16 sps:$4 sm:$0xff]  }
  0x5a   :  { %3390 = vmatpush3.msra.mxu0 %v100_v14  ;;  %v3507_v4 = vld [vmem:[#allocation8 + $0x3a4] ss:$16 sps:$4 sm:$0xff]   ;;  %v3505_v6 = vld [vmem:[#allocation8 + $0x3a0] ss:$16 sps:$4 sm:$0xff]  }
  0x5b   :  { %3391 = vmatprep.subr.mxu0 %v4060_v0  ;;  %1813 = vmatpush1.bf16.msra.mxu1 %v3474_v46  ;;  %v3508_v7 = vld [vmem:[#allocation8 + $0x184] ss:$16 sps:$4 sm:$0xff]   ;;  %v3510_v9 = vld [vmem:[#allocation8 + $0x180] ss:$16 sps:$4 sm:$0xff]  }
  0x5c   :  { %3392 = vmatpush3.msra.mxu0 %v99_v15  ;;  %1814 = vmatprep.subr.bf16.mxu1 %v3478_v48  ;;  %v3513_v8 = vld [vmem:[#allocation8 + $0x384] ss:$16 sps:$4 sm:$0xff]   ;;  %v3511_v10 = vld [vmem:[#allocation8 + $0x380] ss:$16 sps:$4 sm:$0xff]  }
  0x5d   :  { %3393 = vmatprep.subr.mxu0 %v4060_v0  ;;  %v3514_v11 = vld [vmem:[#allocation8 + $0x164] ss:$16 sps:$4 sm:$0xff]   ;;  %v3516_v13 = vld [vmem:[#allocation8 + $0x160] ss:$16 sps:$4 sm:$0xff]  }
  0x5e   :  { %3394 = vmatpush3.msra.mxu0 %v98_v16  ;;  %v3519_v12 = vld [vmem:[#allocation8 + $0x364] ss:$16 sps:$4 sm:$0xff]   ;;  %v3517_v14 = vld [vmem:[#allocation8 + $0x360] ss:$16 sps:$4 sm:$0xff]  }
  0x5f   :  { %3396 = vmatmul.mubr.f32.vlgmr.msra.gmra.mxu0 %v97_v17  ;;  %1843 = vmatprep.subr.bf16.mxu0 %v3447_v22  ;;  %v3520_v15 = vld [vmem:[#allocation8 + $0x144] ss:$16 sps:$4 sm:$0xff]   ;;  %v3522_v17 = vld [vmem:[#allocation8 + $0x140] ss:$16 sps:$4 sm:$0xff]  }
  0x60   :  { %1844 = vmatpush1.bf16.msra.mxu0 %v3445_v21  ;;  %1875 = vmatprep.mubr.bf16.mxu0 %v4212_v52  ;;  %v3525_v16 = vld [vmem:[#allocation8 + $0x344] ss:$16 sps:$4 sm:$0xff]   ;;  %v3523_v18 = vld [vmem:[#allocation8 + $0x340] ss:$16 sps:$4 sm:$0xff]  }
  0x61   :  { %1845 = vmatprep.subr.bf16.mxu0 %v3453_v24  ;;  %1815 = vmatpush1.bf16.msra.mxu1 %v3480_v51  ;;  %v3526_v19 = vld [vmem:[#allocation8 + $0x124] ss:$16 sps:$4 sm:$0xff]   ;;  %v3528_v21 = vld [vmem:[#allocation8 + $0x120] ss:$16 sps:$4 sm:$0xff]  }
  0x62   :  { %1816 = vmatprep.subr.bf16.mxu1 %v3484_v54  ;;  %v3531_v20 = vld [vmem:[#allocation8 + $0x324] ss:$16 sps:$4 sm:$0xff]   ;;  %v3529_v22 = vld [vmem:[#allocation8 + $0x320] ss:$16 sps:$4 sm:$0xff]  }
  0x63   :  { %v3532_v23 = vld [vmem:[#allocation8 + $0x104] ss:$16 sps:$4 sm:$0xff]   ;;  %v3534_v25 = vld [vmem:[#allocation8 + $0x100] ss:$16 sps:$4 sm:$0xff]  }
  0x64   :  { %1846 = vmatpush1.bf16.msra.mxu0 %v3451_v26  ;;  %v3537_v24 = vld [vmem:[#allocation8 + $0x304] ss:$16 sps:$4 sm:$0xff]   ;;  %v3535_v27 = vld [vmem:[#allocation8 + $0x300] ss:$16 sps:$4 sm:$0xff]  }
  0x65   :  { %1847 = vmatprep.subr.bf16.mxu0 %v3459_v28  ;;  %1817 = vmatpush1.bf16.msra.mxu1 %v3486_v56  ;;  %v207_v26 = vld [vmem:[#allocation2] sm:$0xff]  ;;  %v209_v29 = vld [vmem:[#allocation2 + $0x10] sm:$0xff]  ;;  %v4065_v56 = vmov 0  }
  0x66   :  { %1818 = vmatprep.subr.bf16.mxu1 %v3490_v58  ;;  %v3540_v28 = vld [vmem:[#allocation8 + $0x4e4] ss:$16 sps:$4 sm:$0xff]   ;;  %v4215_v31 = vpack.c.bf16 %v207_v26, %v207_v26  ;;  %v4217_v35 = vpack.c.bf16 %v209_v29, %v209_v29  ;;  %v3541_v36 = vld [vmem:[#allocation8 + $0x6e0] ss:$16 sps:$4 sm:$0xff]  }
  0x67   :  { %v3544_v39 = vld [vmem:[#allocation8 + $0x4c0] ss:$16 sps:$4 sm:$0xff]   ;;  %v3552_v42 = vld [vmem:[#allocation8 + $0x4a4] ss:$16 sps:$4 sm:$0xff]  }
  0x68   :  { %1848 = vmatpush1.bf16.msra.mxu0 %v3457_v30  ;;  %v3543_v30 = vld [vmem:[#allocation8 + $0x6e4] ss:$16 sps:$4 sm:$0xff]   ;;  %v3550_v44 = vld [vmem:[#allocation8 + $0x4a0] ss:$16 sps:$4 sm:$0xff]  }
  0x69   :  { %1849 = vmatprep.subr.bf16.mxu0 %v3465_v32  ;;  %1819 = vmatpush2.bf16.msra.mxu1 %v3492_v60  ;;  %v3538_v32 = vld [vmem:[#allocation8 + $0x4e0] ss:$16 sps:$4 sm:$0xff]   ;;  %v3558_v46 = vld [vmem:[#allocation8 + $0x484] ss:$16 sps:$4 sm:$0xff]   ;;  %v212_v60 = vld [vmem:[#allocation2 + $0x28] sm:$0xff] }
  0x6a   :  { %1820 = vmatprep.subr.bf16.mxu1 %v3496_v62  ;;  %v3561_v48 = vld [vmem:[#allocation8 + $0x684] ss:$16 sps:$4 sm:$0xff]   ;;  %v3562_v50 = vld [vmem:[#allocation8 + $0x460] ss:$16 sps:$4 sm:$0xff]  }
  0x6b   :  { %v3564_v51 = vld [vmem:[#allocation8 + $0x464] ss:$16 sps:$4 sm:$0xff]   ;;  %v3565_v54 = vld [vmem:[#allocation8 + $0x660] ss:$16 sps:$4 sm:$0xff]  }
  0x6c   :  { %1850 = vmatpush1.bf16.msra.mxu0 %v3463_v38  ;;  %v3549_v38 = vld [vmem:[#allocation8 + $0x6c4] ss:$16 sps:$4 sm:$0xff]   ;;  %v3568_v58 = vld [vmem:[#allocation8 + $0x440] ss:$16 sps:$4 sm:$0xff]  }
  0x6d   :  { %1851 = vmatprep.subr.bf16.mxu0 %v3471_v41  ;;  %1821 = vmatpush2.bf16.msra.mxu1 %v3498_v1  ;;  %v3547_v41 = vld [vmem:[#allocation8 + $0x6c0] ss:$16 sps:$4 sm:$0xff]   ;;  %v3576_v62 = vld [vmem:[#allocation8 + $0x424] ss:$16 sps:$4 sm:$0xff]  }
  0x6e   :  { %1822 = vmatprep.subr.bf16.mxu1 %v3502_v3  ;;  %v3571_v1 = vld [vmem:[#allocation8 + $0x640] ss:$16 sps:$4 sm:$0xff]   ;;  %v3612_v26 = vld [vmem:[#allocation8 + $0x564] ss:$16 sps:$4 sm:$0xff]  }
  0x6f   :  { %v3574_v3 = vld [vmem:[#allocation8 + $0x420] ss:$16 sps:$4 sm:$0xff]  }
  0x70   :  { %1852 = vmatpush1.bf16.msra.mxu0 %v3469_v43  ;;  %v3555_v43 = vld [vmem:[#allocation8 + $0x6a4] ss:$16 sps:$4 sm:$0xff]   ;;  %v3610_v29 = vld [vmem:[#allocation8 + $0x560] ss:$16 sps:$4 sm:$0xff]  }
  0x71   :  { %1853 = vmatprep.subr.bf16.mxu0 %v3477_v45  ;;  %1823 = vmatpush2.bf16.msra.mxu1 %v3504_v5  ;;  %v3553_v45 = vld [vmem:[#allocation8 + $0x6a0] ss:$16 sps:$4 sm:$0xff]  }
  0x72   :  { %1824 = vmatprep.subr.bf16.mxu1 %v3508_v7  ;;  %v3577_v5 = vld [vmem:[#allocation8 + $0x620] ss:$16 sps:$4 sm:$0xff]  }
  0x73   :  { %v3580_v7 = vld [vmem:[#allocation8 + $0x400] ss:$16 sps:$4 sm:$0xff]  }
  0x74   :  { %1854 = vmatpush1.bf16.msra.mxu0 %v3475_v47  ;;  %v3556_v47 = vld [vmem:[#allocation8 + $0x480] ss:$16 sps:$4 sm:$0xff]  }
  0x75   :  { %1855 = vmatprep.subr.bf16.mxu0 %v3483_v49  ;;  %1825 = vmatpush2.bf16.msra.mxu1 %v3510_v9  ;;  %v3559_v49 = vld [vmem:[#allocation8 + $0x680] ss:$16 sps:$4 sm:$0xff]  }
  0x76   :  { %1826 = vmatprep.subr.bf16.mxu1 %v3514_v11  ;;  %v3583_v9 = vld [vmem:[#allocation8 + $0x600] ss:$16 sps:$4 sm:$0xff]  }
  0x77   :  { %v3586_v11 = vld [vmem:[#allocation8 + $0x5e0] ss:$16 sps:$4 sm:$0xff]  }
  0x78   :  { %1856 = vmatpush1.bf16.msra.mxu0 %v3481_v53 }
  0x79   :  { %1857 = vmatprep.subr.bf16.mxu0 %v3489_v55  ;;  %1827 = vmatpush2.bf16.msra.mxu1 %v3516_v13  ;;  %v3567_v55 = vld [vmem:[#allocation8 + $0x664] ss:$16 sps:$4 sm:$0xff]   ;;  %v3589_v13 = vld [vmem:[#allocation8 + $0x7e0] ss:$16 sps:$4 sm:$0xff]  }
  0x7a   :  { %1828 = vmatprep.subr.bf16.mxu1 %v3520_v15  ;;  %v214_v15 = vld [vmem:[#allocation2 + $0x38] sm:$0xff] }
  0x7c   :  { %1858 = vmatpush1.bf16.msra.mxu0 %v3487_v57 }
  0x7d   :  { %1859 = vmatprep.subr.bf16.mxu0 %v3495_v59  ;;  %1829 = vmatpush2.bf16.msra.mxu1 %v3522_v17  ;;  %v3570_v59 = vld [vmem:[#allocation8 + $0x444] ss:$16 sps:$4 sm:$0xff]   ;;  %v4226_v17 = vpack.c.bf16 %v214_v15, %v214_v15  ;;  %v3678_v15 = vld [vmem:[#allocation8 + $0x22c] ss:$16 sps:$4 sm:$0xff]  }
  0x7e   :  { %1830 = vmatprep.subr.bf16.mxu1 %v3526_v19  ;;  %v3595_v19 = vld [vmem:[#allocation8 + $0x7c0] ss:$16 sps:$4 sm:$0xff]  }
  0x80   :  { %1860 = vmatpush2.bf16.msra.mxu0 %v3493_v61  ;;  %v3573_v61 = vld [vmem:[#allocation8 + $0x644] ss:$16 sps:$4 sm:$0xff]  }
  0x81   :  { %1861 = vmatprep.subr.bf16.mxu0 %v3501_v63  ;;  %1831 = vmatpush2.bf16.msra.mxu1 %v3528_v21  ;;  %v4223_v63 = vpack.c.bf16 %v212_v60, %v212_v60  ;;  %v3598_v21 = vld [vmem:[#allocation8 + $0x5a0] ss:$16 sps:$4 sm:$0xff]  }
  0x82   :  { %1832 = vmatprep.subr.bf16.mxu1 %v3532_v23  ;;  %v3601_v23 = vld [vmem:[#allocation8 + $0x7a0] ss:$16 sps:$4 sm:$0xff]  }
  0x84   :  { %1862 = vmatpush2.bf16.msra.mxu0 %v3499_v2  ;;  %v3579_v2 = vld [vmem:[#allocation8 + $0x624] ss:$16 sps:$4 sm:$0xff]  }
  0x85   :  { %1863 = vmatprep.subr.bf16.mxu0 %v3507_v4  ;;  %1833 = vmatpush2.bf16.msra.mxu1 %v3534_v25  ;;  %v3582_v4 = vld [vmem:[#allocation8 + $0x404] ss:$16 sps:$4 sm:$0xff]   ;;  %v3604_v25 = vld [vmem:[#allocation8 + $0x580] ss:$16 sps:$4 sm:$0xff]  }
  0x86   :  { %1884 = vmatprep.subr.bf16.mxu1 %v3540_v28  ;;  %v3615_v28 = vld [vmem:[#allocation8 + $0x764] ss:$16 sps:$4 sm:$0xff]  }
  0x88   :  { %1864 = vmatpush2.bf16.msra.mxu0 %v3505_v6  ;;  %1835 = vmatmul.mubr.bf16.vlgmr.msra.gmra.mxu1 %v4215_v31  ;;  %v3585_v6 = vld [vmem:[#allocation8 + $0x604] ss:$16 sps:$4 sm:$0xff]  }
  0x89   :  { %1865 = vmatprep.subr.bf16.mxu0 %v3513_v8  ;;  %1885 = vmatpush1.bf16.msra.mxu1 %v3538_v32  ;;  %v3588_v8 = vld [vmem:[#allocation8 + $0x5e4] ss:$16 sps:$4 sm:$0xff]   ;;  %v3613_v32 = vld [vmem:[#allocation8 + $0x760] ss:$16 sps:$4 sm:$0xff]  }
  0x8a   :  { %1916 = vmatprep.mubr.bf16.mxu1 %v4223_v63 }
  0x8c   :  { %1866 = vmatpush2.bf16.msra.mxu0 %v3511_v10  ;;  %v3591_v10 = vld [vmem:[#allocation8 + $0x7e4] ss:$16 sps:$4 sm:$0xff]  }
  0x8d   :  { %1867 = vmatprep.subr.bf16.mxu0 %v3519_v12  ;;  %v3594_v12 = vld [vmem:[#allocation8 + $0x5c4] ss:$16 sps:$4 sm:$0xff]  }
  0x90   :  { %1868 = vmatpush2.bf16.msra.mxu0 %v3517_v14  ;;  %v3597_v14 = vld [vmem:[#allocation8 + $0x7c4] ss:$16 sps:$4 sm:$0xff]  }
  0x91   :  { %1869 = vmatprep.subr.bf16.mxu0 %v3525_v16  ;;  %v3592_v16 = vld [vmem:[#allocation8 + $0x5c0] ss:$16 sps:$4 sm:$0xff]  }
  0x94   :  { %1870 = vmatpush2.bf16.msra.mxu0 %v3523_v18  ;;  %v3600_v18 = vld [vmem:[#allocation8 + $0x5a4] ss:$16 sps:$4 sm:$0xff]  }
  0x95   :  { %1871 = vmatprep.subr.bf16.mxu0 %v3531_v20  ;;  %v3603_v20 = vld [vmem:[#allocation8 + $0x7a4] ss:$16 sps:$4 sm:$0xff]  }
  0x98   :  { %1872 = vmatpush2.bf16.msra.mxu0 %v3529_v22  ;;  %v3606_v22 = vld [vmem:[#allocation8 + $0x584] ss:$16 sps:$4 sm:$0xff]  }
  0x99   :  { %1873 = vmatprep.subr.bf16.mxu0 %v3537_v24  ;;  %v3609_v24 = vld [vmem:[#allocation8 + $0x784] ss:$16 sps:$4 sm:$0xff]  }
  0x9c   :  { %1874 = vmatpush2.bf16.msra.mxu0 %v3535_v27  ;;  %v3607_v27 = vld [vmem:[#allocation8 + $0x780] ss:$16 sps:$4 sm:$0xff]  }
  0x9d   :  { %1925 = vmatprep.subr.bf16.mxu0 %v3543_v30  ;;  %v3618_v30 = vld [vmem:[#allocation8 + $0x544] ss:$16 sps:$4 sm:$0xff]  }
  0x9f   :  { %1876 = vmatmul.mubr.bf16.vlgmr.msra.gmra.mxu0 %v4217_v35 }
  0xa0   :  { %1926 = vmatpush1.bf16.msra.mxu0 %v3541_v36  ;;  %1957 = vmatprep.mubr.bf16.mxu0 %v4226_v17  ;;  %v3621_v36 = vld [vmem:[#allocation8 + $0x744] ss:$16 sps:$4 sm:$0xff]  }
  0xa1   :  { %1927 = vmatprep.subr.bf16.mxu0 %v3549_v38  ;;  %v3624_v38 = vld [vmem:[#allocation8 + $0x524] ss:$16 sps:$4 sm:$0xff]  }
  0xa4   :  { %1928 = vmatpush1.bf16.msra.mxu0 %v3547_v41  ;;  %v3627_v41 = vld [vmem:[#allocation8 + $0x724] ss:$16 sps:$4 sm:$0xff]  }
  0xa5   :  { %1929 = vmatprep.subr.bf16.mxu0 %v3555_v43 }
  0xa8   :  { %1930 = vmatpush1.bf16.msra.mxu0 %v3553_v45  ;;  %v3630_v45 = vld [vmem:[#allocation8 + $0x504] ss:$16 sps:$4 sm:$0xff]  }
  0xa9   :  { %1931 = vmatprep.subr.bf16.mxu0 %v3561_v48 }
  0xac   :  { %1932 = vmatpush1.bf16.msra.mxu0 %v3559_v49  ;;  %v3633_v49 = vld [vmem:[#allocation8 + $0x704] ss:$16 sps:$4 sm:$0xff]  }
  0xad   :  { %1933 = vmatprep.subr.bf16.mxu0 %v3567_v55  ;;  %v3631_v55 = vld [vmem:[#allocation8 + $0x700] ss:$16 sps:$4 sm:$0xff]  }
  0xb0   :  { %1934 = vmatpush1.bf16.msra.mxu0 %v3565_v54 }
  0xb1   :  { %1935 = vmatprep.subr.bf16.mxu0 %v3573_v61  ;;  %v3639_v61 = vld [vmem:[#allocation8 + $0xec] ss:$16 sps:$4 sm:$0xff]  }
  0xb4   :  { %1936 = vmatpush1.bf16.msra.mxu0 %v3571_v1  ;;  %v3640_v1 = vld [vmem:[#allocation8 + $0x2e8] ss:$16 sps:$4 sm:$0xff]  }
  0xb5   :  { %1937 = vmatprep.subr.bf16.mxu0 %v3579_v2  ;;  %v3646_v2 = vld [vmem:[#allocation8 + $0x2c8] ss:$16 sps:$4 sm:$0xff]  }
  0xb8   :  { %1938 = vmatpush1.bf16.msra.mxu0 %v3577_v5  ;;  %v3652_v5 = vld [vmem:[#allocation8 + $0x2a8] ss:$16 sps:$4 sm:$0xff]  }
  0xb9   :  { %1939 = vmatprep.subr.bf16.mxu0 %v3585_v6  ;;  %v3654_v6 = vld [vmem:[#allocation8 + $0x2ac] ss:$16 sps:$4 sm:$0xff]  }
  0xbc   :  { %1940 = vmatpush1.bf16.msra.mxu0 %v3583_v9  ;;  %v3660_v9 = vld [vmem:[#allocation8 + $0x28c] ss:$16 sps:$4 sm:$0xff]  }
  0xbd   :  { %1941 = vmatprep.subr.bf16.mxu0 %v3591_v10  ;;  %v3664_v10 = vld [vmem:[#allocation8 + $0x268] ss:$16 sps:$4 sm:$0xff]  }
  0xc0   :  { %1942 = vmatpush2.bf16.msra.mxu0 %v3589_v13  ;;  %v3672_v13 = vld [vmem:[#allocation8 + $0x24c] ss:$16 sps:$4 sm:$0xff]  }
  0xc1   :  { %1943 = vmatprep.subr.bf16.mxu0 %v3597_v14  ;;  %v3676_v14 = vld [vmem:[#allocation8 + $0x228] ss:$16 sps:$4 sm:$0xff]  }
  0xc4   :  { %1944 = vmatpush2.bf16.msra.mxu0 %v3595_v19  ;;  %v3690_v19 = vld [vmem:[#allocation8 + $0x3ec] ss:$16 sps:$4 sm:$0xff]  }
  0xc5   :  { %1945 = vmatprep.subr.bf16.mxu0 %v3603_v20  ;;  %v3694_v20 = vld [vmem:[#allocation8 + $0x3c8] ss:$16 sps:$4 sm:$0xff]  }
  0xc8   :  { %1946 = vmatpush2.bf16.msra.mxu0 %v3601_v23  ;;  %v3702_v23 = vld [vmem:[#allocation8 + $0x3ac] ss:$16 sps:$4 sm:$0xff]  }
  0xc9   :  { %1947 = vmatprep.subr.bf16.mxu0 %v3609_v24  ;;  %v3706_v24 = vld [vmem:[#allocation8 + $0x388] ss:$16 sps:$4 sm:$0xff]  }
  0xcc   :  { %1948 = vmatpush2.bf16.msra.mxu0 %v3607_v27  ;;  %v3714_v27 = vld [vmem:[#allocation8 + $0x36c] ss:$16 sps:$4 sm:$0xff]  }
  0xcd   :  { %1949 = vmatprep.subr.bf16.mxu0 %v3615_v28  ;;  %v3718_v28 = vld [vmem:[#allocation8 + $0x348] ss:$16 sps:$4 sm:$0xff]  }
  0xd0   :  { %1950 = vmatpush2.bf16.msra.mxu0 %v3613_v32  ;;  %v3726_v32 = vld [vmem:[#allocation8 + $0x32c] ss:$16 sps:$4 sm:$0xff]  }
  0xd1   :  { %1951 = vmatprep.subr.bf16.mxu0 %v3621_v36  ;;  %v3730_v36 = vld [vmem:[#allocation8 + $0x308] ss:$16 sps:$4 sm:$0xff]  }
 0x11f   :  { %v4203_v33 = vpop.f32.mrf.mxu0 }
 0x120   :  { %185 = vrot.lane.b32.xlu0 %v4203_v33, %s4063_s3  ;;  %v189_v34 = vmax.f32 %v4203_v33, 0.0  ;;  %s2960_s3 = sshll.u32 %s4070_s17, 4  ;;  %s2961_s3 = int_to_ptr.vmem [resolvable:$true] %s2960_s3 }
 0x121   :  { %v3397_v37 = vpop.f32.mrf.mxu0  ;;  %p4006_p12 = scmp.lt.s32.totalorder %s2961_s3, %s2961_s3 }
 0x122   :  { %196 = vrot.lane.b32.xlu1 %v189_v34, %s4064_s18  ;;  %v3546_v37 = vld [vmem:[#allocation8 + $0x4c4] ss:$16 sps:$4 sm:$0xff]   ;;  %s4001_s18 = scalar_lea.vmem %s2961_s3, 512 }
 0x123   :  { %1886 = vmatprep.subr.bf16.mxu1 %v3546_v37  ;;  %v3616_v37 = vld [vmem:[#allocation8 + $0x540] ss:$16 sps:$4 sm:$0xff]   ;;  %p4002_p11 = scmp.ne.s32.totalorder %s2961_s3, %s4001_s18  ;;  %p4007_p13 = scmp.lt.s32.totalorder %s4001_s18, %s4001_s18 }
 0x124   :  { %1887 = vmatpush1.bf16.msra.mxu1 %v3544_v39  ;;  %v3619_v39 = vld [vmem:[#allocation8 + $0x740] ss:$16 sps:$4 sm:$0xff]  }
 0x125   :  { %1888 = vmatprep.subr.bf16.mxu1 %v3552_v42  ;;  %v4066_v42 = vmov 65535   ;;  %1952 = vmatpush2.bf16.msra.mxu0 %v3619_v39  ;;  %v3736_v39 = vld [vmem:[#allocation8 + $0x6e8] ss:$16 sps:$4 sm:$0xff]   ;;  %p4008_p0 = por %p4007_p13, %p4006_p12 }
 0x126   :  { %v1788_v43 = vsel %vm1786_vm2, 4294967295, %v4066_v42  ;;  %1953 = vmatprep.subr.bf16.mxu0 %v3627_v41  ;;  %v3744_v41 = vld [vmem:[#allocation8 + $0x6cc] ss:$16 sps:$4 sm:$0xff]   ;;  %v3742_v42 = vld [vmem:[#allocation8 + $0x6c8] ss:$16 sps:$4 sm:$0xff]  }
 0x127   :  { %v4229_v48 = vsel %vm1787_vm3, %v1788_v43, 0  ;;  %v3750_v43 = vld [vmem:[#allocation8 + $0x6ac] ss:$16 sps:$4 sm:$0xff]   ;;  %p4009_p1 = pnand %p4008_p0, %p4002_p11 }
 0x128   :  { %1889 = vmatpush1.bf16.msra.mxu1 %v3550_v44  ;;  %v3622_v44 = vld [vmem:[#allocation8 + $0x520] ss:$16 sps:$4 sm:$0xff]  }
 0x129   :  { %1890 = vmatprep.subr.bf16.mxu1 %v3558_v46  ;;  %v3636_v46 = vld [vmem:[#allocation8 + $0x804] ss:$16 sps:$4 sm:$0x1f]  }
 0x12a   :  { %v1794_v54 = vand.u32 %v3636_v46, %v4229_v48  ;;  %v3754_v46 = vld [vmem:[#allocation8 + $0x688] ss:$16 sps:$4 sm:$0xff]  }
 0x12c   :  { %1891 = vmatpush1.bf16.msra.mxu1 %v3556_v47  ;;  %v3625_v47 = vld [vmem:[#allocation8 + $0x720] ss:$16 sps:$4 sm:$0xff]  }
 0x12d   :  { %1892 = vmatprep.subr.bf16.mxu1 %v3564_v51  ;;  %v211_v51 = vld [vmem:[#allocation2 + $0x20] sm:$0xff]  ;;  %1954 = vmatpush2.bf16.msra.mxu0 %v3625_v47  ;;  %v3762_v47 = vld [vmem:[#allocation8 + $0x66c] ss:$16 sps:$4 sm:$0xff]  }
 0x12e   :  { %1955 = vmatprep.subr.bf16.mxu0 %v3633_v49  ;;  %v3768_v49 = vld [vmem:[#allocation8 + $0x64c] ss:$16 sps:$4 sm:$0xff]  }
 0x130   :  { %1893 = vmatpush1.bf16.msra.mxu1 %v3562_v50  ;;  %v3628_v50 = vld [vmem:[#allocation8 + $0x500] ss:$16 sps:$4 sm:$0xff]  }
 0x131   :  { %1894 = vmatprep.subr.bf16.mxu1 %v3570_v59  ;;  %1956 = vmatpush2.bf16.msra.mxu0 %v3631_v55  ;;  %v3786_v55 = vld [vmem:[#allocation8 + $0x7ec] ss:$16 sps:$4 sm:$0xff]  }
 0x134   :  { %1895 = vmatpush1.bf16.msra.mxu1 %v3568_v58  ;;  %v4232_v58 = vpack.c.bf16 %v211_v51, %v211_v51  ;;  %v3772_v51 = vld [vmem:[#allocation8 + $0x628] ss:$16 sps:$4 sm:$0xff]  }
 0x135   :  { %1896 = vmatprep.subr.bf16.mxu1 %v3576_v62  ;;  %v3642_v62 = vld [vmem:[#allocation8 + $0x2ec] ss:$16 sps:$4 sm:$0xff]  }
 0x136   :  { %2048 = vmatprep.subr.bf16.mxu0 %v3642_v62  ;;  %v3798_v62 = vld [vmem:[#allocation8 + $0x7ac] ss:$16 sps:$4 sm:$0xff]  }
 0x138   :  { %1897 = vmatpush1.bf16.msra.mxu1 %v3574_v3  ;;  %v3648_v3 = vld [vmem:[#allocation8 + $0x2cc] ss:$16 sps:$4 sm:$0xff]  }
 0x139   :  { %1898 = vmatprep.subr.bf16.mxu1 %v3582_v4 }
 0x13c   :  { %1899 = vmatpush1.bf16.msra.mxu1 %v3580_v7 }
 0x13d   :  { %1900 = vmatprep.subr.bf16.mxu1 %v3588_v8 }
 0x140   :  { %1901 = vmatpush2.bf16.msra.mxu1 %v3586_v11  ;;  %v3666_v11 = vld [vmem:[#allocation8 + $0x26c] ss:$16 sps:$4 sm:$0xff]  }
 0x141   :  { %1902 = vmatprep.subr.bf16.mxu1 %v3594_v12  ;;  %v3670_v12 = vld [vmem:[#allocation8 + $0x248] ss:$16 sps:$4 sm:$0xff]  }
 0x144   :  { %1903 = vmatpush2.bf16.msra.mxu1 %v3592_v16  ;;  %v3684_v16 = vld [vmem:[#allocation8 + $0x20c] ss:$16 sps:$4 sm:$0xff]  }
 0x145   :  { %1904 = vmatprep.subr.bf16.mxu1 %v3600_v18  ;;  %v3688_v18 = vld [vmem:[#allocation8 + $0x3e8] ss:$16 sps:$4 sm:$0xff]  }
 0x148   :  { %1905 = vmatpush2.bf16.msra.mxu1 %v3598_v21  ;;  %v3696_v21 = vld [vmem:[#allocation8 + $0x3cc] ss:$16 sps:$4 sm:$0xff]  }
 0x149   :  { %1906 = vmatprep.subr.bf16.mxu1 %v3606_v22  ;;  %v3700_v22 = vld [vmem:[#allocation8 + $0x3a8] ss:$16 sps:$4 sm:$0xff]  }
 0x14c   :  { %1907 = vmatpush2.bf16.msra.mxu1 %v3604_v25  ;;  %v3708_v25 = vld [vmem:[#allocation8 + $0x38c] ss:$16 sps:$4 sm:$0xff]  }
 0x14d   :  { %1908 = vmatprep.subr.bf16.mxu1 %v3612_v26  ;;  %v3712_v26 = vld [vmem:[#allocation8 + $0x368] ss:$16 sps:$4 sm:$0xff]  }
 0x150   :  { %1909 = vmatpush2.bf16.msra.mxu1 %v3610_v29  ;;  %v3720_v29 = vld [vmem:[#allocation8 + $0x34c] ss:$16 sps:$4 sm:$0xff]  }
 0x151   :  { %1910 = vmatprep.subr.bf16.mxu1 %v3618_v30  ;;  %v3724_v30 = vld [vmem:[#allocation8 + $0x328] ss:$16 sps:$4 sm:$0xff]  }
 0x154   :  { %1911 = vmatpush2.bf16.msra.mxu1 %v3616_v37  ;;  %v3732_v37 = vld [vmem:[#allocation8 + $0x30c] ss:$16 sps:$4 sm:$0xff]  }
 0x155   :  { %1912 = vmatprep.subr.bf16.mxu1 %v3624_v38  ;;  %v3738_v38 = vld [vmem:[#allocation8 + $0x6ec] ss:$16 sps:$4 sm:$0xff]  }
 0x158   :  { %1913 = vmatpush2.bf16.msra.mxu1 %v3622_v44  ;;  %v3748_v44 = vld [vmem:[#allocation8 + $0x6a8] ss:$16 sps:$4 sm:$0xff]  }
 0x159   :  { %1914 = vmatprep.subr.bf16.mxu1 %v3630_v45  ;;  %v3756_v45 = vld [vmem:[#allocation8 + $0x68c] ss:$16 sps:$4 sm:$0xff]  }
 0x15c   :  { %1915 = vmatpush2.bf16.msra.mxu1 %v3628_v50  ;;  %v3774_v50 = vld [vmem:[#allocation8 + $0x62c] ss:$16 sps:$4 sm:$0xff]  }
 0x15d   :  { %1980 = vmatprep.subr.bf16.mxu1 %v1794_v54  ;;  %v3778_v54 = vld [vmem:[#allocation8 + $0x608] ss:$16 sps:$4 sm:$0xff]  }
 0x15f   :  { %1917 = vmatmul.mubr.bf16.vlgmr.msra.gmra.mxu1 %v4232_v58 }
 0x160   :  { %1998 = vmatprep.mubr.bf16.mxu1 %v4065_v56 }
 0x192   :  { %v186_v53 = vpop.permute.xlu0 %185 }
 0x193   :  { %vm188_vm1 = vcmp.gt.f32.partialorder %v4203_v33, %v186_v53  ;;  %v3634_v53 = vld [vmem:[#allocation8 + $0x800] ss:$16 sps:$4 sm:$0x1f]  }
 0x194   :  { %v190_v57 = vsel %vm188_vm1, 1, %v4065_v56  ;;  %v1791_v59 = vand.u32 %v3634_v53, %v4229_v48  ;;  %v197_v7 = vpop.permute.xlu1 %196  ;;  %v3780_v53 = vld [vmem:[#allocation8 + $0x60c] ss:$16 sps:$4 sm:$0xff]  }
 0x195   :  { %192 = vperm.xlu0 %3441, %v190_v57   ;;  %v213_v57 = vld [vmem:[#allocation2 + $0x30] sm:$0xff] }
 0x196   :  { %v4235_v60 = vpack.c.bf16 %v213_v57, %v213_v57  ;;  %1981 = vmatpush1.bf16.msra.mxu1 %v1791_v59  ;;  %v3784_v57 = vld [vmem:[#allocation8 + $0x7e8] ss:$16 sps:$4 sm:$0xff]   ;;  %v3792_v59 = vld [vmem:[#allocation8 + $0x7cc] ss:$16 sps:$4 sm:$0xff]  }
 0x197   :  { %2007 = vmatprep.subr.bf16.mxu1 %v3639_v61  ;;  %v3790_v61 = vld [vmem:[#allocation8 + $0x7c8] ss:$16 sps:$4 sm:$0xff]  }
 0x198   :  { %1958 = vmatmul.mubr.bf16.vlgmr.msra.gmra.mxu0 %v4235_v60 }
 0x199   :  { %2080 = vmatprep.mubr.bf16.mxu0 %v4212_v52  ;;  %2049 = vmatpush1.bf16.msra.mxu0 %v3640_v1  ;;  %v3658_v52 = vld [vmem:[#allocation8 + $0x288] ss:$16 sps:$4 sm:$0xff]  }
 0x19a   :  { %2050 = vmatprep.subr.bf16.mxu0 %v3648_v3  ;;  %v3796_v1 = vld [vmem:[#allocation8 + $0x7a8] ss:$16 sps:$4 sm:$0xff]  }
 0x19b   :  { %v3802_v3 = vld [vmem:[#allocation8 + $0x788] ss:$16 sps:$4 sm:$0xff]  }
 0x19d   :  { %2051 = vmatpush1.bf16.msra.mxu0 %v3646_v2  ;;  %v3804_v2 = vld [vmem:[#allocation8 + $0x78c] ss:$16 sps:$4 sm:$0xff]  }
 0x19e   :  { %2052 = vmatprep.subr.bf16.mxu0 %v3654_v6  ;;  %v3808_v6 = vld [vmem:[#allocation8 + $0x768] ss:$16 sps:$4 sm:$0xff]  }
 0x1a1   :  { %2053 = vmatpush1.bf16.msra.mxu0 %v3652_v5  ;;  %v1836_v5 = vpop.f32.mrf.mxu1 }
 0x1a2   :  { %2054 = vmatprep.subr.bf16.mxu0 %v3660_v9  ;;  %v3816_v9 = vld [vmem:[#allocation8 + $0x74c] ss:$16 sps:$4 sm:$0xff]  }
 0x1a5   :  { %2055 = vmatpush1.bf16.msra.mxu0 %v3658_v52 }
 0x1a6   :  { %2056 = vmatprep.subr.bf16.mxu0 %v3666_v11 }
 0x1a9   :  { %2057 = vmatpush1.bf16.msra.mxu0 %v3664_v10 }
 0x1aa   :  { %2058 = vmatprep.subr.bf16.mxu0 %v3672_v13 }
 0x1ad   :  { %2059 = vmatpush1.bf16.msra.mxu0 %v3670_v12  ;;  %v3814_v12 = vld [vmem:[#allocation8 + $0x748] ss:$16 sps:$4 sm:$0xff]  }
 0x1ae   :  { %2060 = vmatprep.subr.bf16.mxu0 %v3678_v15 }
 0x1b1   :  { %2061 = vmatpush1.bf16.msra.mxu0 %v3676_v14 }
 0x1b2   :  { %2062 = vmatprep.subr.bf16.mxu0 %v3684_v16 }
 0x210   :  { %v193_v4 = vpop.permute.xlu0 %192 }
 0x211   :  { %vm194_vm4 = vcmp.eq.s32.totalorder %v193_v4, 1  ;;  %v3810_v4 = vld [vmem:[#allocation8 + $0x76c] ss:$16 sps:$4 sm:$0xff]  }
 0x212   :  { %v199_v8 = vsel %vm194_vm4, %v189_v34, %v197_v7  ;;  %v3682_v34 = vld [vmem:[#allocation8 + $0x208] ss:$16 sps:$4 sm:$0xff]   ;;  %v1838_v7 = vpop.f32.mrf.mxu1 }
 0x213   :  { %201 = vrot.lane.b32.xlu1 %v199_v8, %s4067_s19  ;;  %2063 = vmatpush1.bf16.msra.mxu0 %v3682_v34  ;;  %v1877_v8 = vpop.f32.mrf.mxu0  ;;  %v3822_v34 = vld [vmem:[#allocation8 + $0x72c] ss:$16 sps:$4 sm:$0xff]  }
 0x214   :  { %2064 = vmatprep.subr.bf16.mxu0 %v3690_v19  ;;  %v1878_v52 = vadd.f32 %v1877_v8, %v1836_v5  ;;  %v1840_v10 = vpop.f32.mrf.mxu1  ;;  %v3820_v19 = vld [vmem:[#allocation8 + $0x728] ss:$16 sps:$4 sm:$0xff]   ;;  %v3705_v8 = vld [vmem:[#allocation8 + $0x18c] ss:$16 sps:$4 sm:$0xff]  }
 0x215   :  { %v1879_v11 = vpop.f32.mrf.mxu0  ;;  %v3842_v5 = vld [vmem:[%s4420_s6 + $0x28] sm:$0xff]  }
 0x216   :  { %v1880_v13 = vadd.f32 %v1879_v11, %v1838_v7  ;;  %v1841_v14 = vpop.f32.mrf.mxu1  ;;  %v3697_v7 = vld [vmem:[#allocation8 + $0x1a8] ss:$16 sps:$4 sm:$0xff]   ;;  %v3711_v11 = vld [vmem:[#allocation8 + $0x16c] ss:$16 sps:$4 sm:$0xff]  }
 0x217   :  { %2065 = vmatpush2.bf16.msra.mxu0 %v3688_v18  ;;  %v1881_v15 = vpop.f32.mrf.mxu0  ;;  %v3703_v10 = vld [vmem:[#allocation8 + $0x188] ss:$16 sps:$4 sm:$0xff]  }
 0x218   :  { %2066 = vmatprep.subr.bf16.mxu0 %v3696_v21  ;;  %v3709_v14 = vld [vmem:[#allocation8 + $0x168] ss:$16 sps:$4 sm:$0xff]   ;;  %v3717_v15 = vld [vmem:[#allocation8 + $0x14c] ss:$16 sps:$4 sm:$0xff]  }
 0x219   :  { %v1882_v16 = vpop.f32.mrf.mxu0 }
 0x21a   :  { %v3723_v16 = vld [vmem:[#allocation8 + $0x12c] ss:$16 sps:$4 sm:$0xff]  }
 0x21b   :  { %2067 = vmatpush2.bf16.msra.mxu0 %v3694_v20 }
 0x21c   :  { %2068 = vmatprep.subr.bf16.mxu0 %v3702_v23 }
 0x21f   :  { %2069 = vmatpush2.bf16.msra.mxu0 %v3700_v22  ;;  %v1918_v18 = vpop.f32.mrf.mxu1 }
 0x220   :  { %2070 = vmatprep.subr.bf16.mxu0 %v3708_v25  ;;  %v1919_v20 = vadd.f32 %v1918_v18, %v1878_v52  ;;  %v3844_v52 = vld [vmem:[%s4420_s6 + $0x20] sm:$0xff]   ;;  %v3721_v18 = vld [vmem:[#allocation8 + $0x128] ss:$16 sps:$4 sm:$0xff]  }
 0x221   :  { %v1920_v22 = vpop.f32.mrf.mxu1 }
 0x223   :  { %2071 = vmatpush2.bf16.msra.mxu0 %v3706_v24  ;;  %v1921_v24 = vadd.f32 %v1920_v22, %v1880_v13  ;;  %v3847_v13 = vld [vmem:[%s4420_s6 + $0x50] sm:$0xff]   ;;  %v3733_v22 = vld [vmem:[#allocation8 + $0x4e8] ss:$16 sps:$4 sm:$0xff]  }
 0x224   :  { %2072 = vmatprep.subr.bf16.mxu0 %v3714_v27 }
 0x227   :  { %2073 = vmatpush2.bf16.msra.mxu0 %v3712_v26  ;;  %v3828_v26 = vld [vmem:[#allocation8 + $0x70c] ss:$16 sps:$4 sm:$0xff]  }
 0x228   :  { %2074 = vmatprep.subr.bf16.mxu0 %v3720_v29 }
 0x22b   :  { %2075 = vmatpush2.bf16.msra.mxu0 %v3718_v28  ;;  %v3637_v28 = vld [vmem:[#allocation8 + $0xe8] ss:$16 sps:$4 sm:$0xff]  }
 0x22c   :  { %2076 = vmatprep.subr.bf16.mxu0 %v3726_v32  ;;  %v1922_v32 = vpop.f32.mrf.mxu1 }
 0x22d   :  { %v3852_v32 = vld [vmem:[%s4420_s6] sm:$0xff]  }
 0x22f   :  { %2077 = vmatpush2.bf16.msra.mxu0 %v3724_v30  ;;  %v3826_v30 = vld [vmem:[#allocation8 + $0x708] ss:$16 sps:$4 sm:$0xff]  }
 0x230   :  { %2078 = vmatprep.subr.bf16.mxu0 %v3732_v37 }
 0x233   :  { %2079 = vmatpush2.bf16.msra.mxu0 %v3730_v36  ;;  %v3645_v36 = vld [vmem:[#allocation8 + $0xcc] ss:$16 sps:$4 sm:$0xff]  }
 0x234   :  { %2130 = vmatprep.subr.bf16.mxu0 %v3738_v38 }
 0x236   :  { %2081 = vmatmul.mubr.bf16.vlgmr.msra.gmra.mxu0 %v4217_v35  ;;  %v3760_v35 = vld [vmem:[#allocation8 + $0x668] ss:$16 sps:$4 sm:$0xff]  }
 0x237   :  { %2162 = vmatprep.mubr.bf16.mxu0 %v4226_v17  ;;  %2131 = vmatpush1.bf16.msra.mxu0 %v3736_v39  ;;  %v3766_v17 = vld [vmem:[#allocation8 + $0x648] ss:$16 sps:$4 sm:$0xff]  }
 0x238   :  { %2132 = vmatprep.subr.bf16.mxu0 %v3744_v41 }
 0x23b   :  { %2133 = vmatpush1.bf16.msra.mxu0 %v3742_v42  ;;  %v3643_v42 = vld [vmem:[#allocation8 + $0xc8] ss:$16 sps:$4 sm:$0xff]  }
 0x23c   :  { %2134 = vmatprep.subr.bf16.mxu0 %v3750_v43  ;;  %v3651_v43 = vld [vmem:[#allocation8 + $0xac] ss:$16 sps:$4 sm:$0xff]  }
 0x23f   :  { %2135 = vmatpush1.bf16.msra.mxu0 %v3748_v44 }
 0x240   :  { %2136 = vmatprep.subr.bf16.mxu0 %v3756_v45  ;;  %v3649_v45 = vld [vmem:[#allocation8 + $0xa8] ss:$16 sps:$4 sm:$0xff]  }
 0x243   :  { %2137 = vmatpush1.bf16.msra.mxu0 %v3754_v46  ;;  %v3657_v46 = vld [vmem:[#allocation8 + $0x8c] ss:$16 sps:$4 sm:$0xff]  }
 0x244   :  { %2138 = vmatprep.subr.bf16.mxu0 %v3762_v47  ;;  %v3655_v47 = vld [vmem:[#allocation8 + $0x88] ss:$16 sps:$4 sm:$0xff]  }
 0x247   :  { %2139 = vmatpush1.bf16.msra.mxu0 %v3760_v35  ;;  %v3663_v35 = vld [vmem:[#allocation8 + $0x6c] ss:$16 sps:$4 sm:$0xff]  }
 0x248   :  { %2140 = vmatprep.subr.bf16.mxu0 %v3768_v49  ;;  %v3661_v49 = vld [vmem:[#allocation8 + $0x68] ss:$16 sps:$4 sm:$0xff]  }
 0x24b   :  { %2141 = vmatpush1.bf16.msra.mxu0 %v3766_v17  ;;  %v3669_v17 = vld [vmem:[#allocation8 + $0x4c] ss:$16 sps:$4 sm:$0xff]  }
 0x24c   :  { %2142 = vmatprep.subr.bf16.mxu0 %v3774_v50  ;;  %v3667_v50 = vld [vmem:[#allocation8 + $0x48] ss:$16 sps:$4 sm:$0xff]  }
 0x24f   :  { %2143 = vmatpush1.bf16.msra.mxu0 %v3772_v51  ;;  %v3673_v51 = vld [vmem:[#allocation8 + $0x28] ss:$16 sps:$4 sm:$0xff]  }
 0x250   :  { %2144 = vmatprep.subr.bf16.mxu0 %v3780_v53  ;;  %v3679_v53 = vld [vmem:[#allocation8 + $0x8] ss:$16 sps:$4 sm:$0xff]  }
 0x253   :  { %2145 = vmatpush1.bf16.msra.mxu0 %v3778_v54  ;;  %v3687_v54 = vld [vmem:[#allocation8 + $0x1ec] ss:$16 sps:$4 sm:$0xff]  }
 0x254   :  { %2146 = vmatprep.subr.bf16.mxu0 %v3786_v55  ;;  %v3837_v55 = vld [vmem:[%s4420_s6 + $0x78] sm:$0xff]  }
 0x257   :  { %2147 = vmatpush2.bf16.msra.mxu0 %v3784_v57  ;;  %v3838_v57 = vld [vmem:[%s4420_s6 + $0x38] sm:$0xff]  }
 0x258   :  { %2148 = vmatprep.subr.bf16.mxu0 %v3792_v59  ;;  %v1959_v25 = vpop.f32.mrf.mxu0  ;;  %v3839_v59 = vld [vmem:[%s4420_s6 + $0x70] sm:$0xff]  }
 0x259   :  { %v4246_v29 = vadd.f32 %v1959_v25, %v1919_v20  ;;  %v3727_v20 = vld [vmem:[#allocation8 + $0x108] ss:$16 sps:$4 sm:$0xff]  }
 0x25a   :  { %v1961_v37 = vpop.f32.mrf.mxu0  ;;  %v3739_v25 = vld [vmem:[#allocation8 + $0x4c8] ss:$16 sps:$4 sm:$0xff]  }
 0x25b   :  { %2149 = vmatpush2.bf16.msra.mxu0 %v3790_v61  ;;  %v4250_v39 = vadd.f32 %v1961_v37, %v1921_v24  ;;  %v3685_v61 = vld [vmem:[#allocation8 + $0x1e8] ss:$16 sps:$4 sm:$0xff]   ;;  %v3848_v24 = vld [vmem:[%s4420_s6 + $0x10] sm:$0xff]   ;;  %v3759_v37 = vld [vmem:[#allocation8 + $0x46c] ss:$16 sps:$4 sm:$0xff]  }
 0x25c   :  { %2150 = vmatprep.subr.bf16.mxu0 %v3798_v62  ;;  %v1963_v41 = vpop.f32.mrf.mxu0  ;;  %v3693_v62 = vld [vmem:[#allocation8 + $0x1cc] ss:$16 sps:$4 sm:$0xff]  }
 0x25d   :  { %v3765_v41 = vld [vmem:[#allocation8 + $0x44c] ss:$16 sps:$4 sm:$0xff]  }
 0x25e   :  { %v1964_v44 = vpop.f32.mrf.mxu0 }
 0x25f   :  { %2151 = vmatpush2.bf16.msra.mxu0 %v3796_v1  ;;  %v3840_v1 = vld [vmem:[%s4420_s6 + $0x30] sm:$0xff]   ;;  %v3769_v44 = vld [vmem:[#allocation8 + $0x428] ss:$16 sps:$4 sm:$0xff]  }
 0x260   :  { %2152 = vmatprep.subr.bf16.mxu0 %v3804_v2  ;;  %v3841_v2 = vld [vmem:[%s4420_s6 + $0x68] sm:$0xff]  }
 0x263   :  { %2153 = vmatpush2.bf16.msra.mxu0 %v3802_v3  ;;  %v3691_v3 = vld [vmem:[#allocation8 + $0x1c8] ss:$16 sps:$4 sm:$0xff]  }
 0x264   :  { %2154 = vmatprep.subr.bf16.mxu0 %v3810_v4  ;;  %v3699_v4 = vld [vmem:[#allocation8 + $0x1ac] ss:$16 sps:$4 sm:$0xff]  }
 0x267   :  { %2155 = vmatpush2.bf16.msra.mxu0 %v3808_v6  ;;  %v3843_v6 = vld [vmem:[%s4420_s6 + $0x60] sm:$0xff]  }
 0x268   :  { %2156 = vmatprep.subr.bf16.mxu0 %v3816_v9  ;;  %v3845_v9 = vld [vmem:[%s4420_s6 + $0x58] sm:$0xff]  }
 0x26b   :  { %2157 = vmatpush2.bf16.msra.mxu0 %v3814_v12  ;;  %v3846_v12 = vld [vmem:[%s4420_s6 + $0x18] sm:$0xff]  }
 0x26c   :  { %2158 = vmatprep.subr.bf16.mxu0 %v3822_v34  ;;  %v3715_v34 = vld [vmem:[#allocation8 + $0x148] ss:$16 sps:$4 sm:$0xff]  }
 0x26f   :  { %2159 = vmatpush2.bf16.msra.mxu0 %v3820_v19  ;;  %v3729_v19 = vld [vmem:[#allocation8 + $0x10c] ss:$16 sps:$4 sm:$0xff]  }
 0x270   :  { %2160 = vmatprep.subr.bf16.mxu0 %v3828_v26  ;;  %v3747_v26 = vld [vmem:[#allocation8 + $0x4ac] ss:$16 sps:$4 sm:$0xff]  }
 0x273   :  { %2161 = vmatpush2.bf16.msra.mxu0 %v3826_v30  ;;  %v3753_v30 = vld [vmem:[#allocation8 + $0x48c] ss:$16 sps:$4 sm:$0xff]  }
 0x274   :  { %3316 = vmatprep.subr.bf16.mxu0 %v3837_v55  ;;  %v3813_v55 = vld [vmem:[#allocation8 + $0x54c] ss:$16 sps:$4 sm:$0xff]  }
 0x276   :  { %2163 = vmatmul.mubr.bf16.vlgmr.msra.gmra.mxu0 %v4235_v60  ;;  %v3681_v60 = vld [vmem:[#allocation8 + $0xc] ss:$16 sps:$4 sm:$0xff]  }
 0x277   :  { %3317 = vmatpush3.bf16.msra.mxu0 %v3838_v57  ;;  %v3811_v57 = vld [vmem:[#allocation8 + $0x548] ss:$16 sps:$4 sm:$0xff]  }
 0x278   :  { %3318 = vmatprep.subr.bf16.mxu0 %v3839_v59  ;;  %v3819_v59 = vld [vmem:[#allocation8 + $0x52c] ss:$16 sps:$4 sm:$0xff]  }
 0x27b   :  { %3319 = vmatpush3.bf16.msra.mxu0 %v3840_v1  ;;  %v3831_v1 = vld [vmem:[#allocation8 + $0x80c] ss:$16 sps:$4 sm:$0x1f]  }
 0x27c   :  { %3320 = vmatprep.subr.bf16.mxu0 %v3841_v2  ;;  %v3823_v2 = vld [vmem:[#allocation8 + $0x508] ss:$16 sps:$4 sm:$0xff]  }
 0x27f   :  { %3321 = vmatpush3.bf16.msra.mxu0 %v3842_v5 }
 0x280   :  { %3322 = vmatprep.subr.bf16.mxu0 %v3843_v6 }
 0x283   :  { %3323 = vmatpush3.bf16.msra.mxu0 %v3844_v52 }
 0x284   :  { %3324 = vmatprep.subr.bf16.mxu0 %v3845_v9 }
 0x285   :  { %v202_v21 = vpop.permute.xlu1 %201 }
 0x286   :  { %v205_v23 = vsel %vm204_vm5, %v202_v21, %v4203_v33  ;;  %v1923_v33 = vpop.f32.mrf.mxu1  ;;  %v3735_v21 = vld [vmem:[#allocation8 + $0x4ec] ss:$16 sps:$4 sm:$0xff]  }
 0x287   :  { %v206_v27 = vpack.c.bf16 %v205_v23, %v205_v23  ;;  %3325 = vmatpush3.bf16.msra.mxu0 %v3846_v12  ;;  %v3741_v23 = vld [vmem:[#allocation8 + $0x4cc] ss:$16 sps:$4 sm:$0xff]   ;;  %v3757_v33 = vld [vmem:[#allocation8 + $0x468] ss:$16 sps:$4 sm:$0xff]  }
 0x288   :  { %3326 = vmatprep.subr.bf16.mxu0 %v3847_v13 }
 0x289   :  { %v4248_v38 = vsel %vm223_vm6, %v206_v27, 1065369472  ;;  %2231 = vrot.lane.b32.xlu1 %v206_v27, %s4068_s20  ;;  %v3849_v27 = vld [vmem:[%s4420_s6 + $0x48] sm:$0xff]  }
 0x28a   :  { %3235 = vmatmul.mubr.msk.bf16.vlgmr.msra.gmra.mxu1 %vm1783_vm7, %v4248_v38 }
 0x28b   :  { %2008 = vmatpush1.bf16.msra.mxu1 %v3637_v28  ;;  %2039 = vmatprep.mubr.bf16.mxu1 %v4207_v40  ;;  %v3675_v40 = vld [vmem:[#allocation8 + $0x2c] ss:$16 sps:$4 sm:$0xff]  }
 0x28c   :  { %2009 = vmatprep.subr.bf16.mxu1 %v3645_v36  ;;  %3327 = vmatpush3.bf16.msra.mxu0 %v3848_v24  ;;  %v3850_v28 = vld [vmem:[%s4420_s6 + $0x8] sm:$0xff]   ;;  %v3860_v24 = vld [vmem:[%s4420_s6 + $0xa0] sm:$0xff]  }
 0x28d   :  { %3328 = vmatprep.subr.bf16.mxu0 %v3849_v27  ;;  %v3751_v36 = vld [vmem:[#allocation8 + $0x488] ss:$16 sps:$4 sm:$0xff]  }
 0x28f   :  { %2010 = vmatpush1.bf16.msra.mxu1 %v3643_v42  ;;  %v3763_v42 = vld [vmem:[#allocation8 + $0x448] ss:$16 sps:$4 sm:$0xff]  }
 0x290   :  { %2011 = vmatprep.subr.bf16.mxu1 %v3651_v43  ;;  %3329 = vmatpush3.bf16.msra.mxu0 %v3850_v28  ;;  %v3771_v43 = vld [vmem:[#allocation8 + $0x42c] ss:$16 sps:$4 sm:$0xff]  }
 0x291   :  { %v3861_v28 = vld [vmem:[%s4420_s6 + $0xd8] sm:$0xff]  }
 0x293   :  { %2012 = vmatpush1.bf16.msra.mxu1 %v3649_v45  ;;  %v3777_v45 = vld [vmem:[#allocation8 + $0x40c] ss:$16 sps:$4 sm:$0xff]  }
 0x294   :  { %2013 = vmatprep.subr.bf16.mxu1 %v3657_v46  ;;  %v3775_v46 = vld [vmem:[#allocation8 + $0x408] ss:$16 sps:$4 sm:$0xff]  }
 0x297   :  { %2014 = vmatpush1.bf16.msra.mxu1 %v3655_v47  ;;  %v3783_v47 = vld [vmem:[#allocation8 + $0x5ec] ss:$16 sps:$4 sm:$0xff]  }
 0x298   :  { %2015 = vmatprep.subr.bf16.mxu1 %v3663_v35  ;;  %v3781_v35 = vld [vmem:[#allocation8 + $0x5e8] ss:$16 sps:$4 sm:$0xff]  }
 0x29b   :  { %2016 = vmatpush1.bf16.msra.mxu1 %v3661_v49  ;;  %v3789_v49 = vld [vmem:[#allocation8 + $0x5cc] ss:$16 sps:$4 sm:$0xff]  }
 0x29c   :  { %2017 = vmatprep.subr.bf16.mxu1 %v3669_v17  ;;  %v3787_v17 = vld [vmem:[#allocation8 + $0x5c8] ss:$16 sps:$4 sm:$0xff]  }
 0x29f   :  { %2018 = vmatpush1.bf16.msra.mxu1 %v3667_v50  ;;  %v3795_v50 = vld [vmem:[#allocation8 + $0x5ac] ss:$16 sps:$4 sm:$0xff]  }
 0x2a0   :  { %2019 = vmatprep.subr.bf16.mxu1 %v3675_v40  ;;  %v3793_v40 = vld [vmem:[#allocation8 + $0x5a8] ss:$16 sps:$4 sm:$0xff]  }
 0x2a3   :  { %2020 = vmatpush1.bf16.msra.mxu1 %v3673_v51  ;;  %v3801_v51 = vld [vmem:[#allocation8 + $0x58c] ss:$16 sps:$4 sm:$0xff]  }
 0x2a4   :  { %2021 = vmatprep.subr.bf16.mxu1 %v3681_v60  ;;  %v3799_v60 = vld [vmem:[#allocation8 + $0x588] ss:$16 sps:$4 sm:$0xff]  }
 0x2a7   :  { %2022 = vmatpush1.bf16.msra.mxu1 %v3679_v53  ;;  %v3807_v53 = vld [vmem:[#allocation8 + $0x56c] ss:$16 sps:$4 sm:$0xff]  }
 0x2a8   :  { %2023 = vmatprep.subr.bf16.mxu1 %v3687_v54  ;;  %v3805_v54 = vld [vmem:[#allocation8 + $0x568] ss:$16 sps:$4 sm:$0xff]  }
 0x2ab   :  { %2024 = vmatpush2.bf16.msra.mxu1 %v3685_v61  ;;  %v3817_v61 = vld [vmem:[#allocation8 + $0x528] ss:$16 sps:$4 sm:$0xff]  }
 0x2ac   :  { %2025 = vmatprep.subr.bf16.mxu1 %v3693_v62  ;;  %v3825_v62 = vld [vmem:[#allocation8 + $0x50c] ss:$16 sps:$4 sm:$0xff]  }
 0x2af   :  { %2026 = vmatpush2.bf16.msra.mxu1 %v3691_v3  ;;  %v3829_v3 = vld [vmem:[#allocation8 + $0x808] ss:$16 sps:$4 sm:$0x1f]  }
 0x2b0   :  { %2027 = vmatprep.subr.bf16.mxu1 %v3699_v4  ;;  %v1800_v4 = vand.u32 %v3831_v1, %v4229_v48  ;;  %v1797_v5 = vand.u32 %v3829_v3, %v4229_v48 }
 0x2b3   :  { %2028 = vmatpush2.bf16.msra.mxu1 %v3697_v7  ;;  %v3832_v7 = vld [vmem:[%s4419_s5 + $0x20] sm:$0x1f]  }
 0x2b4   :  { %2029 = vmatprep.subr.bf16.mxu1 %v3705_v8  ;;  %v2282_v9 = vand.u32 %v3832_v7, %v4229_v48  ;;  %v2228_v48 = vld [vmem:[#allocation7] sm:$0xff] }
 0x2b5   :  { %v2229_v12 = vpack.c.bf16 %v2228_v48, %v2228_v48 }
 0x2b7   :  { %2030 = vmatpush2.bf16.msra.mxu1 %v3703_v10 }
 0x2b8   :  { %2031 = vmatprep.subr.bf16.mxu1 %v3711_v11  ;;  %v3834_v11 = vld [vmem:[%s4419_s5 + $0x10] sm:$0xff]  }
 0x2bb   :  { %2032 = vmatpush2.bf16.msra.mxu1 %v3709_v14  ;;  %v3836_v14 = vld [vmem:[%s4419_s5] sm:$0xff]  }
 0x2bc   :  { %2033 = vmatprep.subr.bf16.mxu1 %v3717_v15  ;;  %v3853_v15 = vld [vmem:[%s4420_s6 + $0xf8] sm:$0xff]  }
 0x2bf   :  { %2034 = vmatpush2.bf16.msra.mxu1 %v3715_v34 }
 0x2c0   :  { %2035 = vmatprep.subr.bf16.mxu1 %v3723_v16  ;;  %v3854_v16 = vld [vmem:[%s4420_s6 + $0xb8] sm:$0xff]  }
 0x2c3   :  { %2036 = vmatpush2.bf16.msra.mxu1 %v3721_v18  ;;  %v3855_v18 = vld [vmem:[%s4420_s6 + $0xf0] sm:$0xff]  }
 0x2c4   :  { %2037 = vmatprep.subr.bf16.mxu1 %v3729_v19 }
 0x2c7   :  { %2038 = vmatpush2.bf16.msra.mxu1 %v3727_v20  ;;  %v3856_v20 = vld [vmem:[%s4420_s6 + $0xb0] sm:$0xff]  }
 0x2c8   :  { %2089 = vmatprep.subr.bf16.mxu1 %v3735_v21  ;;  %v3857_v21 = vld [vmem:[%s4420_s6 + $0xe8] sm:$0xff]  }
 0x2ca   :  { %2040 = vmatmul.mubr.bf16.vlgmr.msra.gmra.mxu1 %v4215_v31  ;;  %v3745_v31 = vld [vmem:[#allocation8 + $0x4a8] ss:$16 sps:$4 sm:$0xff]  }
 0x2cb   :  { %2090 = vmatpush1.bf16.msra.mxu1 %v3733_v22  ;;  %2121 = vmatprep.mubr.bf16.mxu1 %v4223_v63  ;;  %v3851_v63 = vld [vmem:[%s4420_s6 + $0x40] sm:$0xff]   ;;  %v3858_v22 = vld [vmem:[%s4420_s6 + $0xa8] sm:$0xff]  }
 0x2cc   :  { %2091 = vmatprep.subr.bf16.mxu1 %v3741_v23  ;;  %3330 = vmatprep.subr.bf16.mxu0 %v3851_v63  ;;  %v3859_v23 = vld [vmem:[%s4420_s6 + $0xe0] sm:$0xff]  }
 0x2cd   :  { %3331 = vmatpush3.bf16.msra.mxu0 %v3852_v32  ;;  %v3862_v32 = vld [vmem:[%s4420_s6 + $0x98] sm:$0xff]  }
 0x2ce   :  { %3412 = vmatprep.subr.bf16.mxu0 %v4060_v0 }
 0x2cf   :  { %2092 = vmatpush1.bf16.msra.mxu1 %v3739_v25 }
 0x2d0   :  { %2093 = vmatprep.subr.bf16.mxu1 %v3747_v26 }
 0x2d3   :  { %2094 = vmatpush1.bf16.msra.mxu1 %v3745_v31 }
 0x2d4   :  { %2095 = vmatprep.subr.bf16.mxu1 %v3753_v30 }
 0x2d7   :  { %2096 = vmatpush1.bf16.msra.mxu1 %v3751_v36 }
 0x2d8   :  { %2097 = vmatprep.subr.bf16.mxu1 %v3759_v37 }
 0x2db   :  { %2098 = vmatpush1.bf16.msra.mxu1 %v3757_v33 }
 0x2dc   :  { %2099 = vmatprep.subr.bf16.mxu1 %v3765_v41 }
 0x2df   :  { %2100 = vmatpush1.bf16.msra.mxu1 %v3763_v42  ;;  %v3863_v42 = vld [vmem:[%s4420_s6 + $0xd0] sm:$0xff]  }
 0x2e0   :  { %2101 = vmatprep.subr.bf16.mxu1 %v3771_v43 }
 0x2e3   :  { %2102 = vmatpush1.bf16.msra.mxu1 %v3769_v44 }
 0x2e4   :  { %2103 = vmatprep.subr.bf16.mxu1 %v3777_v45 }
 0x2e7   :  { %2104 = vmatpush1.bf16.msra.mxu1 %v3775_v46 }
 0x2e8   :  { %2105 = vmatprep.subr.bf16.mxu1 %v3783_v47 }
 0x2eb   :  { %2106 = vmatpush2.bf16.msra.mxu1 %v3781_v35  ;;  %v3865_v35 = vld [vmem:[%s4420_s6 + $0xc8] sm:$0xff]  }
 0x2ec   :  { %2107 = vmatprep.subr.bf16.mxu1 %v3789_v49  ;;  %v3866_v49 = vld [vmem:[%s4420_s6 + $0x88] sm:$0xff]  }
 0x2ef   :  { %2108 = vmatpush2.bf16.msra.mxu1 %v3787_v17  ;;  %v3867_v17 = vld [vmem:[%s4420_s6 + $0xc0] sm:$0xff]  }
 0x2f0   :  { %2109 = vmatprep.subr.bf16.mxu1 %v3795_v50  ;;  %v3868_v50 = vld [vmem:[%s4420_s6 + $0x80] sm:$0xff]  }
 0x2f3   :  { %2110 = vmatpush2.bf16.msra.mxu1 %v3793_v40  ;;  %v3869_v40 = vld [vmem:[%s4420_s6 + $0x108] sm:$0xff]  }
 0x2f4   :  { %2111 = vmatprep.subr.bf16.mxu1 %v3801_v51  ;;  %v3870_v51 = vld [vmem:[%s4420_s6 + $0x100] sm:$0xff]  }
 0x2f6   :  { %v4310_v6 = vpop.f32.mrf.mxu0 }
 0x2f7   :  { %2112 = vmatpush2.bf16.msra.mxu1 %v3799_v60 }
 0x2f8   :  { %2113 = vmatprep.subr.bf16.mxu1 %v3807_v53  ;;  %v4317_v8 = vpop.f32.mrf.mxu0 }
 0x2fa   :  { %v2086_v52 = vpop.f32.mrf.mxu0 }
 0x2fb   :  { %2114 = vmatpush2.bf16.msra.mxu1 %v3805_v54  ;;  %v2232_v13 = vpop.permute.xlu1 %2231 }
 0x2fc   :  { %2115 = vmatprep.subr.bf16.mxu1 %v3813_v55  ;;  %v2087_v10 = vpop.f32.mrf.mxu0  ;;  %v2236_v34 = vsel %vm2233_vm8, %v2229_v12, %v2232_v13 }
 0x2fd   :  { %v2238_v19 = vsel %vm2237_vm9, %v2236_v34, 1065369472 }
 0x2ff   :  { %2116 = vmatpush2.bf16.msra.mxu1 %v3811_v57 }
 0x300   :  { %2117 = vmatprep.subr.bf16.mxu1 %v3819_v59 }
 0x303   :  { %2118 = vmatpush2.bf16.msra.mxu1 %v3817_v61 }
 0x304   :  { %2119 = vmatprep.subr.bf16.mxu1 %v3825_v62 }
 0x307   :  { %2120 = vmatpush2.bf16.msra.mxu1 %v3823_v2 }
 0x308   :  { %2185 = vmatprep.subr.bf16.mxu1 %v1800_v4 }
 0x30a   :  { %2122 = vmatmul.mubr.bf16.vlgmr.msra.gmra.mxu1 %v4232_v58  ;;  %v3833_v58 = vld [vmem:[%s4419_s5 + $0x18] sm:$0xff]  }
 0x30b   :  { %2186 = vmatpush1.bf16.msra.mxu1 %v1797_v5  ;;  %2203 = vmatprep.mubr.bf16.mxu1 %v4065_v56 }
 0x30c   :  { %3398 = vmatprep.subr.bf16.mxu1 %v4060_v0 }
 0x312   :  { %3236 = vmatmul.mubr.msk.bf16.vlgmr.msra.gmra.mxu1 %vm1783_vm7, %v4248_v38  ;;  %v3835_v38 = vld [vmem:[%s4419_s5 + $0x8] sm:$0xff]  }
 0x313   :  { %3399 = vmatpush3.bf16.msra.mxu1 %v2282_v9  ;;  %3408 = vmatprep.mubr.msk.bf16.mxu1 %vm4061_vm0, %v4060_v0 }
 0x314   :  { %3400 = vmatprep.subr.bf16.mxu1 %v4060_v0 }
 0x317   :  { %3401 = vmatpush3.bf16.msra.mxu1 %v3833_v58 }
 0x318   :  { %3402 = vmatprep.subr.bf16.mxu1 %v4060_v0 }
 0x31b   :  { %3403 = vmatpush3.bf16.msra.mxu1 %v3834_v11 }
 0x31c   :  { %3404 = vmatprep.subr.bf16.mxu1 %v4060_v0 }
 0x31f   :  { %3405 = vmatpush3.bf16.msra.mxu1 %v3835_v38 }
 0x320   :  { %3406 = vmatprep.subr.bf16.mxu1 %v4060_v0 }
 0x323   :  { %3407 = vmatpush3.bf16.msra.mxu1 %v3836_v14 }
 0x324   :  { %3338 = vmatprep.subr.bf16.mxu1 %v3853_v15 }
 0x326   :  { %3409 = vmatmul.mubr.msk.bf16.vlgmr.msra.gmra.mxu1 %vm2278_vm10, %v2238_v19 }
 0x327   :  { %3339 = vmatpush3.bf16.msra.mxu1 %v3854_v16 }
 0x328   :  { %3340 = vmatprep.subr.bf16.mxu1 %v3855_v18 }
 0x32b   :  { %3341 = vmatpush3.bf16.msra.mxu1 %v3856_v20 }
 0x32c   :  { %3342 = vmatprep.subr.bf16.mxu1 %v3857_v21 }
 0x32f   :  { %3343 = vmatpush3.bf16.msra.mxu1 %v3858_v22 }
 0x330   :  { %3344 = vmatprep.subr.bf16.mxu1 %v3859_v23 }
 0x333   :  { %3345 = vmatpush3.bf16.msra.mxu1 %v3860_v24 }
 0x334   :  { %3346 = vmatprep.subr.bf16.mxu1 %v3861_v28  ;;  %v3874_v28 = vld [vmem:[#allocation10 + $0x38] ss:$24 sps:$4 sm:$0xff]  }
 0x336   :  { %v2164_v63 = vpop.f32.mrf.mxu0 }
 0x337   :  { %3347 = vmatpush3.bf16.msra.mxu1 %v3862_v32  ;;  %v3879_v32 = vld [vmem:[#allocation10 + $0x4] ss:$24 sps:$4 sm:$0xff]  }
 0x338   :  { %v2166_v33 = vpop.f32.mrf.mxu0  ;;  %3348 = vmatprep.subr.bf16.mxu1 %v3863_v42  ;;  %v3885_v42 = vld [vmem:[#allocation10 + $0x44] ss:$24 sps:$4 sm:$0xff]  }
 0x33a   :  { %v2168_v44 = vpop.f32.mrf.mxu0 }
 0x33c   :  { %v2169_v47 = vpop.f32.mrf.mxu0 }
 0x34a   :  { %v2000_v25 = vpop.f32.mrf.mxu1 }
 0x34b   :  { %v2001_v26 = vadd.f32 %v2000_v25, %v4246_v29 }
 0x34c   :  { %v2002_v27 = vpop.f32.mrf.mxu1 }
 0x34d   :  { %vm2212_vm11 = vcmp.gt.f32.partialorder %v2001_v26, 0.0  ;;  %v2216_v31 = vmul.f32 0.2, %v2001_v26  ;;  %v2003_v30 = vadd.f32 %v2002_v27, %v4250_v39  ;;  %v3864_v39 = vld [vmem:[%s4420_s6 + $0x90] sm:$0xff]   ;;  %v3873_v27 = vld [vmem:[#allocation10 + $0x34] ss:$24 sps:$4 sm:$0xff]  }
 0x34e   :  { %v2004_v36 = vpop.f32.mrf.mxu1  ;;  %3349 = vmatpush3.bf16.msra.mxu1 %v3864_v39  ;;  %s4069_s6 = smov 96  }
 0x34f   :  { %v2220_v37 = vsel %vm2212_vm11, %v2001_v26, %v2216_v31  ;;  %vm2213_vm12 = vcmp.gt.f32.partialorder %v2003_v30, 0.0  ;;  %v2217_v29 = vmul.f32 0.2, %v2003_v30  ;;  %3350 = vmatprep.subr.bf16.mxu1 %v3865_v35  ;;  %v3871_v26 = vld [vmem:[#allocation10 + $0x30] ss:$24 sps:$4 sm:$0xff]  }
 0x350   :  { %2224 = vst [vmem:[#allocation12] sm:$0xff] %v2220_v37  ;;  %v2005_v41 = vpop.f32.mrf.mxu1  ;;  %v2327_v46 = vpack.c.bf16 %v2220_v37, %v2220_v37  ;;  %v3876_v31 = vld [vmem:[#allocation10 + $0x3c] ss:$24 sps:$4 sm:$0xff]   ;;  %v3882_v36 = vld [vmem:[#allocation10 + $0xc] ss:$24 sps:$4 sm:$0xff]  }
 0x351   :  { %v2221_v43 = vsel %vm2213_vm12, %v2003_v30, %v2217_v29  ;;  %v3877_v29 = vld [vmem:[#allocation10] ss:$24 sps:$4 sm:$0xff]  }
 0x352   :  { %2225 = vst [vmem:[#allocation12 + $0x8] sm:$0xff] %v2221_v43  ;;  %v2328_v45 = vpack.c.bf16 %v2221_v43, %v2221_v43  ;;  %3351 = vmatpush3.bf16.msra.mxu1 %v3866_v49 }
 0x353   :  { %3352 = vmatprep.subr.bf16.mxu1 %v3867_v17 }
 0x354   :  { %2640 = vmatprep.mubr.bf16.mxu0 %v2328_v45 }
 0x355   :  { %2641 = vmatmul.mubr.bf16.vlgmr.msra.gmra.mxu0 %v2327_v46 }
 0x356   :  { %3416 = vmatprep.mubr.msk.bf16.mxu0 %vm4061_vm0, %v4060_v0  ;;  %3353 = vmatpush3.bf16.msra.mxu1 %v3868_v50  ;;  %vm2604_vm0 = vcmask 261120   ;;  %v3883_v50 = vld [vmem:[#allocation10 + $0x40] ss:$24 sps:$4 sm:$0xff]  }
 0x357   :  { %3413 = vmatpush3.bf16.msra.mxu0 %v3869_v40  ;;  %2821 = vmatprep.subr.bf16.mxu1 %v3873_v27 }
 0x358   :  { %3414 = vmatprep.subr.bf16.mxu0 %v4060_v0 }
 0x35b   :  { %3415 = vmatpush3.bf16.msra.mxu0 %v3870_v51  ;;  %v3888_v51 = vld [vmem:[#allocation10 + $0x14] ss:$24 sps:$4 sm:$0xff]  }
 0x35c   :  { %2862 = vmatprep.subr.bf16.mxu0 %v3876_v31 }
 0x38a   :  { %v2041_v60 = vpop.f32.mrf.mxu1 }
 0x38b   :  { %v2083_v59 = vadd.f32 %v4310_v6, %v2041_v60  ;;  %v3886_v60 = vld [vmem:[#allocation10 + $0x10] ss:$24 sps:$4 sm:$0xff]  }
 0x38c   :  { %v2043_v53 = vpop.f32.mrf.mxu1 }
 0x38d   :  { %v2085_v62 = vadd.f32 %v4317_v8, %v2043_v53 }
 0x38e   :  { %v2045_v54 = vpop.f32.mrf.mxu1 }
 0x390   :  { %v2046_v55 = vpop.f32.mrf.mxu1 }
 0x3ca   :  { %v2123_v57 = vpop.f32.mrf.mxu1 }
 0x3cb   :  { %v2124_v1 = vadd.f32 %v2123_v57, %v2083_v59 }
 0x3cc   :  { %v2125_v61 = vpop.f32.mrf.mxu1 }
 0x3cd   :  { %v2126_v3 = vadd.f32 %v2125_v61, %v2085_v62  ;;  %v2165_v0 = vadd.f32 %v2164_v63, %v2124_v1 }
 0x3ce   :  { %v2127_v2 = vpop.f32.mrf.mxu1 }
 0x3cf   :  { %v2167_v7 = vadd.f32 %v2166_v33, %v2126_v3  ;;  %v3880_v33 = vld [vmem:[#allocation10 + $0x8] ss:$24 sps:$4 sm:$0xff]  }
 0x3d0   :  { %v2128_v4 = vpop.f32.mrf.mxu1 }
 0x3d2   :  { %v2205_v5 = vpop.f32.mrf.mxu1 }
 0x3d3   :  { %v2206_v52 = vadd.f32 %v2205_v5, %v2165_v0 }
 0x3d4   :  { %v2207_v9 = vpop.f32.mrf.mxu1 }
 0x3d5   :  { %vm2214_vm13 = vcmp.gt.f32.partialorder %v2206_v52, 0.0  ;;  %v2218_v10 = vmul.f32 0.2, %v2206_v52  ;;  %v2208_v58 = vadd.f32 %v2207_v9, %v2167_v7 }
 0x3d6   :  { %v2209_v11 = vpop.f32.mrf.mxu1 }
 0x3d7   :  { %v2222_v48 = vsel %vm2214_vm13, %v2206_v52, %v2218_v10  ;;  %vm2215_vm14 = vcmp.gt.f32.partialorder %v2208_v58, 0.0  ;;  %v2219_v38 = vmul.f32 0.2, %v2208_v58 }
 0x3d8   :  { %2226 = vst [vmem:[#allocation12 + $0x10] sm:$0xff] %v2222_v48  ;;  %v2210_v6 = vpop.f32.mrf.mxu1  ;;  %v2329_v13 = vpack.c.bf16 %v2222_v48, %v2222_v48 }
 0x3d9   :  { %v2223_v12 = vsel %vm2215_vm14, %v2208_v58, %v2219_v38 }
 0x3da   :  { %2227 = vst [vmem:[#allocation12 + $0x18] sm:$0xff] %v2223_v12  ;;  %v2330_v8 = vpack.c.bf16 %v2223_v12, %v2223_v12 }
 0x3dc   :  { %2680 = vmatprep.mubr.bf16.mxu1 %v2330_v8 }
 0x3dd   :  { %2681 = vmatmul.mubr.bf16.vlgmr.msra.gmra.mxu1 %v2329_v13 }
 0x3de   :  { %2841 = vmatprep.mubr.bf16.mxu1 %v4065_v56  ;;  %2822 = vmatpush1.bf16.msra.mxu1 %v3871_v26 }
 0x3df   :  { %2823 = vmatprep.subr.bf16.mxu1 %v3879_v32 }
 0x3e2   :  { %2824 = vmatpush1.bf16.msra.mxu1 %v3877_v29 }
 0x3e3   :  { %2903 = vmatprep.subr.bf16.mxu1 %v3885_v42 }
 0x3e6   :  { %v2318_v14 = vpop.f32.mrf.mxu1 }
 0x3e7   :  { %vm2324_vm15 = vcmp.gt.f32.partialorder %v2318_v14, 0.0  ;;  %v2325_v15 = vmul.f32 0.2, %v2318_v14 }
 0x3e8   :  { %v3410_v34 = vpop.f32.mrf.mxu1 }
 0x3e9   :  { %v2326_v16 = vsel %vm2324_vm15, %v2318_v14, %v2325_v15 }
 0x3ea   :  { %v2331_v18 = vpack.c.bf16 %v2326_v16, %v2326_v16  ;;  %v2321_v19 = vpop.f32.mrf.mxu1 }
 0x3ec   :  { %v3411_v20 = vpop.f32.mrf.mxu1  ;;  %3417 = vmatmul.mubr.msk.bf16.vlgmr.msra.gmra.mxu0 %vm2604_vm0, %v2331_v18 }
 0x3ed   :  { %2882 = vmatprep.mubr.bf16.mxu0 %v4065_v56  ;;  %2863 = vmatpush1.bf16.msra.mxu0 %v3874_v28 }
 0x3ee   :  { %2864 = vmatprep.subr.bf16.mxu0 %v3882_v36 }
 0x3f1   :  { %2865 = vmatpush1.bf16.msra.mxu0 %v3880_v33 }
 0x415   :  { %v3332_v21 = vpop.f32.mrf.mxu0 }
 0x417   :  { %v3333_v22 = vpop.f32.mrf.mxu0 }
 0x418   :  { %v3334_v23 = vadd.f32 %v3333_v22, %v3332_v21 }
 0x419   :  { %v3335_v24 = vpop.f32.mrf.mxu0 }
 0x41b   :  { %v3336_v25 = vpop.f32.mrf.mxu0 }
 0x49d   :  { %v3354_v30 = vpop.f32.mrf.mxu1 }
 0x49f   :  { %v3355_v63 = vpop.f32.mrf.mxu1 }
 0x4a0   :  { %v3356_v43 = vadd.f32 %v3355_v63, %v3354_v30 }
 0x4a1   :  { %v3357_v37 = vpop.f32.mrf.mxu1 }
 0x4a2   :  { %v2683_v39 = vadd.f32 %v3356_v43, %v3334_v23 }
 0x4a3   :  { %v3358_v41 = vpop.f32.mrf.mxu1 }
 0x4ac   :  { %v2722_v44 = vpop.f32.mrf.mxu0 }
 0x4ad   :  { %v2723_v45 = vadd.f32 %v2722_v44, %v2683_v39 }
 0x4ae   :  { %v3418_v46 = vpop.f32.mrf.mxu0 }
 0x4af   :  { %2729 = vrot.lane.b32.xlu0 %v2723_v45, %s4069_s6 }
 0x4b0   :  { %v2725_v47 = vpop.f32.mrf.mxu0 }
 0x4b2   :  { %v3419_v35 = vpop.f32.mrf.mxu0 }
 0x521   :  { %v2730_v49 = vpop.permute.xlu0 %2729 }
 0x522   :  { %v2732_v17 = vmul.f32 %v2730_v49, %v2723_v45 }
 0x524   :  { %v2733_v40 = vpack.c.bf16 %v2732_v17, %v2732_v17 }
 0x526   :  { %3290 = vmatmul.mubr.msk.bf16.vlgmr.msra.gmra.mxu1 %vm2604_vm0, %v2733_v40  ;;  %3291 = vmatmul.mubr.msk.bf16.vlgmr.msra.gmra.mxu0 %vm2604_vm0, %v2733_v40 }
 0x527   :  { %2904 = vmatpush1.bf16.msra.mxu1 %v3883_v50  ;;  %2923 = vmatprep.mubr.bf16.mxu1 %v4065_v56 }
 0x528   :  { %2905 = vmatprep.subr.bf16.mxu1 %v3888_v51 }
 0x52b   :  { %2906 = vmatpush1.bf16.msra.mxu1 %v3886_v60 }
 0x52e   :  { %3292 = vmatmul.mubr.msk.bf16.vlgmr.msra.gmra.mxu1 %vm2604_vm0, %v2733_v40 }
 0x52f   :  { %4012 = shalt.err (!%p4009_p1)
}
 0x530   :  { %2963 = dma.vmem_to_hbm [thread:$0]  %s2961_s3, 512, %s4423_s9, [#allocation13]  }
 0x531   :  { %s4071_s9 = smov [#allocation11]  }
 0x532   :  { %s2950_s21 = sshll.u32 %s4071_s9, 4  ;;  %s2951_s21 = int_to_ptr.vmem [resolvable:$true] %s2950_s21 }
 0x533   :  { %s4021_s22 = scalar_lea.vmem %s2951_s21, 768  ;;  %p4026_p3 = scmp.lt.s32.totalorder %s2951_s21, %s2951_s21 }
 0x534   :  { %p4022_p2 = scmp.ne.s32.totalorder %s2951_s21, %s4021_s22  ;;  %p4027_p4 = scmp.lt.s32.totalorder %s4021_s22, %s4021_s22 }
 0x536   :  { %p4028_p5 = por %p4027_p4, %p4026_p3 }
 0x538   :  { %p4029_p6 = pnand %p4028_p5, %p4022_p2 }
 0x5e6   :  { %v2843_v53 = vpop.f32.mrf.mxu1  ;;  %v2884_v56 = vpop.f32.mrf.mxu0 }
 0x5e7   :  { %3889 = vtanh.f32 %v2843_v53 }
 0x5e8   :  { %3891 = vtanh.f32 %v2884_v56  ;;  %v2845_v54 = vpop.f32.mrf.mxu1  ;;  %v2886_v55 = vpop.f32.mrf.mxu0 }
 0x5e9   :  { %3893 = vtanh.f32 %v2845_v54 }
 0x5ea   :  { %3895 = vtanh.f32 %v2886_v55  ;;  %v2847_v57 = vpop.f32.mrf.mxu1  ;;  %v2888_v59 = vpop.f32.mrf.mxu0 }
 0x5ec   :  { %v2848_v61 = vpop.f32.mrf.mxu1  ;;  %v2889_v62 = vpop.f32.mrf.mxu0 }
 0x5ee   :  { %v2925_v1 = vpop.f32.mrf.mxu1 }
 0x5ef   :  { %3897 = vtanh.f32 %v2925_v1 }
 0x5f0   :  { %v2927_v2 = vpop.f32.mrf.mxu1 }
 0x5f1   :  { %3899 = vtanh.f32 %v2927_v2 }
 0x5f2   :  { %v2929_v3 = vpop.f32.mrf.mxu1 }
 0x5f4   :  { %v3890_v4 = vpop.eup %3889  ;;  %v2930_v0 = vpop.f32.mrf.mxu1 }
 0x5f5   :  { %v3892_v5 = vpop.eup %3891  ;;  %2938 = vst [vmem:[#allocation11] sm:$0xff] %v3890_v4 }
 0x5f6   :  { %v3894_v7 = vpop.eup %3893  ;;  %2940 = vst [vmem:[#allocation11 + $0x10] sm:$0xff] %v3892_v5 }
 0x5f7   :  { %v3896_v52 = vpop.eup %3895  ;;  %2939 = vst [vmem:[#allocation11 + $0x8] sm:$0xff] %v3894_v7 }
 0x5f8   :  { %2941 = vst [vmem:[#allocation11 + $0x18] sm:$0xff] %v3896_v52 }
 0x5fc   :  { %v3898_v9 = vpop.eup %3897 }
 0x5fd   :  { %2942 = vst [vmem:[#allocation11 + $0x20] sm:$0xff] %v3898_v9 }
 0x5fe   :  { %v3900_v10 = vpop.eup %3899 }
 0x5ff   :  { %2943 = vst [vmem:[#allocation11 + $0x28] sm:$0xff] %v3900_v10 }
 0x600   :  { %4032 = shalt.err (!%p4029_p6)
}
 0x601   :  { %2953 = dma.vmem_to_hbm [thread:$0]  %s2951_s21, 768, %s4422_s8, [#allocation4]  }
 0x602   :  { %4047 = dma.done.wait [#allocation4], 768  }
 0x603   :  { %4048 = vsyncadd [#allocation4], 4294966528 }
 0x604   :  { %4049 = dma.done.wait [#allocation13], 512  }
 0x605   :  { %4050 = vsyncadd [#allocation13], 4294966784 }
 0x606   :  { %2970 = vsyncpa [#allocation3], 1 }
 0x607   :  { %2971 = vsyncpa [#allocation6], 1 }
 0x608   :  { %2972 = vsyncpa [#allocation9], 1 }
 0x609   :  { %2973 = vsyncpa [#allocation4], 1 }
 0x60a   :  { %2974 = vsyncpa [#allocation13], 1 }

</bundles_post_ra>
